<compile_context>
chip_gen: v6e
topology: v6e:2x2x1
jax: 0.10.0
libtpu: 0.0.40
codegen_flags: <defaults>
</compile_context>

<pallas_src>
import functools

import numpy as np
import jax
import jax.numpy as jnp
from jax.experimental import pallas as pl
from jax.experimental.pallas import tpu as pltpu


def _round_up(x, m):
    return ((x + m - 1) // m) * m


def _tap_masks(H, W, HWp, bb):
    """(9, 1, bb*HWp) f32 validity masks for the 3x3 taps.

    Per image the flattened spatial axis is padded from H*W to HWp lanes; a tap
    is valid iff it stays inside the HxW image (emulates Conv2d zero padding),
    and pad lanes are always invalid.  The per-image mask is tiled bb times so a
    single roll over the whole (bb*HWp)-lane batch block needs only one mask mul.
    """
    HW = H * W
    ys = np.arange(H)[:, None]
    xs = np.arange(W)[None, :]
    m = np.zeros((9, 1, bb * HWp), np.float32)
    for i in range(3):
        for j in range(3):
            dy, dx = i - 1, j - 1
            valid = ((ys + dy >= 0) & (ys + dy < H) &
                     (xs + dx >= 0) & (xs + dx < W)).reshape(-1)
            per_img = np.zeros((HWp,), np.float32)
            per_img[:HW] = valid.astype(np.float32)
            m[i * 3 + j, 0] = np.tile(per_img, bb)
    return jnp.asarray(m)


def _tpu_vmem_and_cores():
    """(vmem_capacity_bytes, num_tensorcores) with conservative fallbacks."""
    vmem = 64 << 20          # conservative default (v7x per-TC VMEM)
    try:
        info = pltpu.get_tpu_info()
        v = getattr(info, "vmem_capacity_bytes", None)
        if v:
            vmem = int(v)
    except Exception:
        pass
    cores = 1
    try:
        cores = int(getattr(jax.devices()[0], "num_cores", 1) or 1)
    except Exception:
        pass
    return vmem, cores


def _block_vmem_bytes(bb, HWp, Cmid, Cout, mxu_itemsize):
    """Approximate per-grid-step VMEM working set (double-buffered I/O blocks +
    scratch + resident constants)."""
    lanes = bb * HWp
    io = 2 * (4 * lanes + 4 * bb * Cout * HWp)           # x + out blocks, x2 buffers
    scratch = 10 * Cmid * lanes * mxu_itemsize           # a1 + 9-tap im2col staging
    consts = (4 * 9 * lanes + 4 * 10 * Cmid + 9 * Cmid * Cout * mxu_itemsize
              + 4 * Cout)
    return io + scratch + consts


def _pick_batch_block(N, HWp, Cmid, Cout, mxu_itemsize, vmem_cap, num_cores):
    """Largest bb dividing N that fits a VMEM budget and a lane cap (bounds the
    live footprint of the (Cout, bb*HWp) matmul result).  On multi-TC chips back
    off so the 'parallel' batch grid has at least `num_cores` steps if possible."""
    max_lanes = 2048
    budget = int(0.45 * vmem_cap)
    divisors = [d for d in range(1, N + 1) if N % d == 0]
    fitting = [d for d in divisors
               if d * HWp <= max_lanes
               and _block_vmem_bytes(d, HWp, Cmid, Cout, mxu_itemsize) <= budget]
    if not fitting:
        fitting = [1]
    bb = max(fitting)
    if num_cores > 1:
        while N // bb < num_cores and bb > 1:
            smaller = [d for d in fitting if d < bb]
            if not smaller:
                break
            bb = max(smaller)
    return bb


def _fused_kernel(x_ref, masks_ref, w1_ref, b1_ref, w2_ref, b2_ref, o_ref,
                  a1_ref, p_ref, *, W, HWp, Cmid, Cout, bb):
    """Fused conv1+ReLU+conv2+ReLU for one batch block of `bb` images.

    x_ref     : (1, bb*HWp) f32      images concatenated along the lane axis
    masks_ref : (9, 1, bb*HWp) f32   per-tap validity masks (0 on borders/pad)
    w1_ref    : (Cmid, 9) f32        conv1 weights  [c, ky*3+kx]
    b1_ref    : (Cmid, 1) f32
    w2_ref    : (Cout, 9*Cmid)       conv2 weights [co, tap*Cmid+ci], MXU dtype
    b2_ref    : (Cout, 1) f32
    o_ref     : (bb, Cout, HWp) f32  output block (channels-first, lane-dense)
    a1_ref    : VMEM (Cmid, bb*HWp)   scratch: conv1 activation
    p_ref     : VMEM (9*Cmid, bb*HWp) scratch: conv2 im2col operand
    """
    lanes = bb * HWp
    taps = [(i - 1, j - 1) for i in range(3) for j in range(3)]

    def shifted(v, t):
        # v: (rows, lanes). result[:, n*HWp+s] = v[:, n*HWp+s+off] for taps that
        # stay inside the HxW image, else 0.  Valid taps never leave the image
        # segment (s+off stays in [0, H*W) < HWp), so one roll over the whole
        # batch block + one mask multiply is exact zero padding for all images.
        dy, dx = taps[t]
        off = dy * W + dx
        if off == 0:
            return v
        r = pltpu.roll(v, shift=(-off) % lanes, axis=v.ndim - 1)  # XLU rotation
        return r * masks_ref[t].astype(v.dtype)                   # VPU mask

    w1 = w1_ref[...]                      # (Cmid, 9)
    b1 = b1_ref[...]                      # (Cmid, 1)
    x = x_ref[...]                        # (1, lanes)

    # ---- conv1 + ReLU on the VPU (Cin=1: an MXU matmul here would be a K=1
    # outer product at ~0% array utilization). 9 rolls amortized over the block.
    acc = jnp.zeros((Cmid, lanes), jnp.float32)
    for t in range(9):
        acc = acc + w1[:, t:t + 1] * shifted(x, t)        # (Cmid,1)*(1,lanes)
    a1_ref[...] = jnp.maximum(acc + b1, 0.0).astype(a1_ref.dtype)

    # ---- conv2 im2col: stage 9 shifted copies of a1 in VMEM scratch (bounds
    # vreg pressure; no register-resident concatenate -> no spills).
    for t in range(9):
        p_ref[pl.ds(t * Cmid, Cmid), :] = shifted(a1_ref[...], t)

    # ---- conv2 + ReLU: ONE batched MXU matmul over the whole batch block,
    # bf16 operands with f32 accumulation.
    y = jnp.dot(w2_ref[...], p_ref[...], preferred_element_type=jnp.float32)
    y = jnp.maximum(y + b2_ref[...], 0.0)                 # (Cout, lanes) f32

    # ---- lane-dense (Cout, HWp) stores, one per image in the block.
    for n in range(bb):
        o_ref[n] = y[:, n * HWp:(n + 1) * HWp].astype(o_ref.dtype)


def feature_extractor(x_nchw, params, mxu_dtype=jnp.bfloat16):
    """Forward pass matching the PyTorch FeatureExtractor.

    x_nchw: (N, 1, H, W) float32 -> (N, 32, H, W) float32.
    mxu_dtype: dtype of the conv2 matmul operands (bf16 by default; pass
    jnp.float32 for bit-tight accuracy at lower MXU throughput).
    """
    N, Cin, H, W = x_nchw.shape
    if Cin != 1:
        raise ValueError("FeatureExtractor expects a single input channel")
    Cmid = params["w1"].shape[0]          # 16
    Cout = params["w2"].shape[0]          # 32
    HW = H * W
    HWp = max(128, _round_up(HW, 128))    # lane-pad -> unmasked lane-dense stores

    mxu_itemsize = jnp.dtype(mxu_dtype).itemsize
    vmem_cap, num_cores = _tpu_vmem_and_cores()
    bb = _pick_batch_block(N, HWp, Cmid, Cout, mxu_itemsize, vmem_cap, num_cores)
    lanes = bb * HWp

    # Wrapper-side work: free reshapes, a zero-pad of the (tiny, 1-channel)
    # input to the lane-padded width, and tiny weight reshuffles.  No activation
    # transposes; NCHW in == NCHW out.
    x_flat = x_nchw.reshape(N, HW)
    if HWp != HW:
        x_flat = jnp.pad(x_flat, ((0, 0), (0, HWp - HW)))
    x_flat = x_flat.reshape(1, N * HWp)

    w1_mat = params["w1"].reshape(Cmid, 9).astype(jnp.float32)       # [c, ky*3+kx]
    b1 = params["b1"].reshape(Cmid, 1).astype(jnp.float32)
    w2_mat = jnp.transpose(params["w2"], (0, 2, 3, 1)).reshape(Cout, 9 * Cmid)
    w2_mat = w2_mat.astype(mxu_dtype)                                # [co, tap*Cmid+ci]
    b2 = params["b2"].reshape(Cout, 1).astype(jnp.float32)
    masks = _tap_masks(H, W, HWp, bb)                                # (9, 1, lanes)

    kernel = functools.partial(_fused_kernel, W=W, HWp=HWp, Cmid=Cmid,
                               Cout=Cout, bb=bb)

    flops = int(2 * N * HW * 9 * Cmid * (1 + Cout))
    bytes_accessed = int(4 * (N * HWp + N * Cout * HWp + masks.size + w1_mat.size
                              + b1.size + b2.size) + mxu_itemsize * w2_mat.size)
    need = _block_vmem_bytes(bb, HWp, Cmid, Cout, mxu_itemsize)
    vmem_limit = int(min(max(32 << 20, 2 * need), int(0.85 * vmem_cap)))

    out = pl.pallas_call(
        kernel,
        out_shape=jax.ShapeDtypeStruct((N, Cout, HWp), jnp.float32),
        grid_spec=pltpu.PrefetchScalarGridSpec(
            num_scalar_prefetch=0,
            grid=(N // bb,),
            in_specs=[
                pl.BlockSpec((1, lanes), lambda n: (0, n)),
                # Constant-index blocks: DMA'd once, kept resident across steps.
                pl.BlockSpec((9, 1, lanes), lambda n: (0, 0, 0)),
                pl.BlockSpec((Cmid, 9), lambda n: (0, 0)),
                pl.BlockSpec((Cmid, 1), lambda n: (0, 0)),
                pl.BlockSpec((Cout, 9 * Cmid), lambda n: (0, 0)),
                pl.BlockSpec((Cout, 1), lambda n: (0, 0)),
            ],
            out_specs=pl.BlockSpec((bb, Cout, HWp), lambda n: (n, 0, 0)),
            scratch_shapes=[
                pltpu.VMEM((Cmid, lanes), mxu_dtype),       # conv1 activation
                pltpu.VMEM((9 * Cmid, lanes), mxu_dtype),   # conv2 im2col operand
            ],
        ),
        compiler_params=pltpu.CompilerParams(
            dimension_semantics=("parallel",),
            vmem_limit_bytes=vmem_limit),
        cost_estimate=pl.CostEstimate(flops=flops, transcendentals=0,
                                      bytes_accessed=bytes_accessed),
    )(x_flat, masks, w1_mat, b1, w2_mat, b2)

    if HWp != HW:
        out = out[:, :, :HW]
    return out.reshape(N, Cout, H, W)


def init_params(key):
    k1, k2, k3, k4 = jax.random.split(key, 4)
    # Deterministic synthetic init (Kaiming-ish), PyTorch layout (Cout, Cin, 3, 3).
    w1 = jax.random.normal(k1, (16, 1, 3, 3), jnp.float32) * (2.0 / (1 * 9)) ** 0.5
    b1 = jax.random.normal(k2, (16,), jnp.float32) * 0.01
    w2 = jax.random.normal(k3, (32, 16, 3, 3), jnp.float32) * (2.0 / (16 * 9)) ** 0.5
    b2 = jax.random.normal(k4, (32,), jnp.float32) * 0.01
    return {"w1": w1, "b1": b1, "w2": w2, "b2": b2}


def _reference(x_nchw, params):
    """Pure-JAX reference (lax conv, NCHW) for correctness checking."""
    def conv(x, w, b):
        y = jax.lax.conv_general_dilated(
            x, w, window_strides=(1, 1), padding="SAME",
            dimension_numbers=("NCHW", "OIHW", "NCHW"))
        return jax.nn.relu(y + b[None, :, None, None])
    h = conv(x_nchw, params["w1"], params["b1"])
    return conv(h, params["w2"], params["b2"])


if __name__ == "__main__":
    key = jax.random.PRNGKey(0)
    pkey, xkey = jax.random.split(key)
    params = init_params(pkey)

    # Small input consistent with Conv2d(1, ...): batch=2, channels=1, 16x16 spatial.
    x = jax.random.normal(xkey, (2, 1, 16, 16), jnp.float32)
    ref = _reference(x, params)

    # 1) Exact-path check (f32 MXU operands): validates the fused structure tightly.
    fe_f32 = jax.jit(functools.partial(feature_extractor, mxu_dtype=jnp.float32))
    out_f32 = jax.block_until_ready(fe_f32(x, params))
    assert out_f32.shape == (2, 32, 16, 16), out_f32.shape
    assert jnp.allclose(out_f32, ref, atol=1e-4, rtol=1e-4), \
        float(jnp.max(jnp.abs(out_f32 - ref)))

    # 2) Default fast path: bf16 MXU operands, f32 accumulation (looser tolerance).
    fe = jax.jit(feature_extractor)
    out = jax.block_until_ready(fe(x, params))
    assert out.shape == (2, 32, 16, 16), out.shape
    assert jnp.allclose(out, ref, atol=7.5e-2, rtol=5e-2), \
        float(jnp.max(jnp.abs(out - ref)))

    print("KERNEL_OK")
</pallas_src>

<mosaic_0001>
module attributes {stable_mosaic.version = 11 : i64} {
  func.func @_fused_kernel(%arg0: i32, %arg1: memref<1x512xf32, #tpu.memory_space<vmem>>, %arg2: memref<9x1x512xf32, #tpu.memory_space<vmem>>, %arg3: memref<16x9xf32, #tpu.memory_space<vmem>>, %arg4: memref<16x1xf32, #tpu.memory_space<vmem>>, %arg5: memref<32x144xf32, #tpu.memory_space<vmem>>, %arg6: memref<32x1xf32, #tpu.memory_space<vmem>>, %arg7: memref<2x32x256xf32, #tpu.memory_space<vmem>>, %arg8: memref<16x512xf32, #tpu.memory_space<vmem>>, %arg9: memref<144x512xf32, #tpu.memory_space<vmem>>) attributes {dimension_semantics = [#tpu.dimension_semantics<parallel>], iteration_bounds = array<i64: 1>, scalar_prefetch = 0 : i64, scratch_operands = 2 : i64, tpu.core_type = #tpu.core_type<tc>, window_params = [{transform_indices = @transform_0, window_bounds = array<i64: 1, 512>}, {pipeline_mode = #tpu.pipeline_mode<synchronous>, transform_indices = @transform_1, window_bounds = array<i64: 9, 1, 512>}, {pipeline_mode = #tpu.pipeline_mode<synchronous>, transform_indices = @transform_2, window_bounds = array<i64: 16, 9>}, {pipeline_mode = #tpu.pipeline_mode<synchronous>, transform_indices = @transform_3, window_bounds = array<i64: 16, 1>}, {pipeline_mode = #tpu.pipeline_mode<synchronous>, transform_indices = @transform_4, window_bounds = array<i64: 32, 144>}, {pipeline_mode = #tpu.pipeline_mode<synchronous>, transform_indices = @transform_5, window_bounds = array<i64: 32, 1>}, {transform_indices = @transform_6, window_bounds = array<i64: 2, 32, 256>}]} {
    %c0 = arith.constant 0 : index
    %c0_0 = arith.constant 0 : index
    %0 = vector.load %arg3[%c0, %c0_0] : memref<16x9xf32, #tpu.memory_space<vmem>>, vector<16x9xf32>
    %c0_1 = arith.constant 0 : index
    %c0_2 = arith.constant 0 : index
    %1 = vector.load %arg4[%c0_1, %c0_2] : memref<16x1xf32, #tpu.memory_space<vmem>>, vector<16x1xf32>
    %c0_3 = arith.constant 0 : index
    %c0_4 = arith.constant 0 : index
    %2 = vector.load %arg1[%c0_3, %c0_4] : memref<1x512xf32, #tpu.memory_space<vmem>>, vector<1x512xf32>
    %cst = arith.constant 0.000000e+00 : f32
    %3 = vector.broadcast %cst : f32 to vector<16x512xf32>
    %4 = vector.extract_strided_slice %0 {offsets = [0, 0], sizes = [16, 1], strides = [1, 1]} : vector<16x9xf32> to vector<16x1xf32>
    %c17_i32 = arith.constant 17 : i32
    %5 = tpu.dynamic_rotate %2 by %c17_i32 dim 1 : vector<1x512xf32>, i32 -> vector<1x512xf32>
    %c0_5 = arith.constant 0 : index
    %c0_6 = arith.constant 0 : index
    %c0_7 = arith.constant 0 : index
    %6 = vector.load %arg2[%c0_5, %c0_6, %c0_7] : memref<9x1x512xf32, #tpu.memory_space<vmem>>, vector<1x1x512xf32>
    %7 = vector.shape_cast %6 : vector<1x1x512xf32> to vector<1x512xf32>
    %8 = arith.mulf %5, %7 : vector<1x512xf32>
    %9 = vector.broadcast %4 : vector<16x1xf32> to vector<16x512xf32>
    %10 = vector.broadcast %8 : vector<1x512xf32> to vector<16x512xf32>
    %11 = arith.mulf %9, %10 : vector<16x512xf32>
    %12 = arith.addf %3, %11 : vector<16x512xf32>
    %13 = vector.extract_strided_slice %0 {offsets = [0, 1], sizes = [16, 1], strides = [1, 1]} : vector<16x9xf32> to vector<16x1xf32>
    %c16_i32 = arith.constant 16 : i32
    %14 = tpu.dynamic_rotate %2 by %c16_i32 dim 1 : vector<1x512xf32>, i32 -> vector<1x512xf32>
    %c1 = arith.constant 1 : index
    %c0_8 = arith.constant 0 : index
    %c0_9 = arith.constant 0 : index
    %15 = vector.load %arg2[%c1, %c0_8, %c0_9] : memref<9x1x512xf32, #tpu.memory_space<vmem>>, vector<1x1x512xf32>
    %16 = vector.shape_cast %15 : vector<1x1x512xf32> to vector<1x512xf32>
    %17 = arith.mulf %14, %16 : vector<1x512xf32>
    %18 = vector.broadcast %13 : vector<16x1xf32> to vector<16x512xf32>
    %19 = vector.broadcast %17 : vector<1x512xf32> to vector<16x512xf32>
    %20 = arith.mulf %18, %19 : vector<16x512xf32>
    %21 = arith.addf %12, %20 : vector<16x512xf32>
    %22 = vector.extract_strided_slice %0 {offsets = [0, 2], sizes = [16, 1], strides = [1, 1]} : vector<16x9xf32> to vector<16x1xf32>
    %c15_i32 = arith.constant 15 : i32
    %23 = tpu.dynamic_rotate %2 by %c15_i32 dim 1 : vector<1x512xf32>, i32 -> vector<1x512xf32>
    %c2 = arith.constant 2 : index
    %c0_10 = arith.constant 0 : index
    %c0_11 = arith.constant 0 : index
    %24 = vector.load %arg2[%c2, %c0_10, %c0_11] : memref<9x1x512xf32, #tpu.memory_space<vmem>>, vector<1x1x512xf32>
    %25 = vector.shape_cast %24 : vector<1x1x512xf32> to vector<1x512xf32>
    %26 = arith.mulf %23, %25 : vector<1x512xf32>
    %27 = vector.broadcast %22 : vector<16x1xf32> to vector<16x512xf32>
    %28 = vector.broadcast %26 : vector<1x512xf32> to vector<16x512xf32>
    %29 = arith.mulf %27, %28 : vector<16x512xf32>
    %30 = arith.addf %21, %29 : vector<16x512xf32>
    %31 = vector.extract_strided_slice %0 {offsets = [0, 3], sizes = [16, 1], strides = [1, 1]} : vector<16x9xf32> to vector<16x1xf32>
    %c1_i32 = arith.constant 1 : i32
    %32 = tpu.dynamic_rotate %2 by %c1_i32 dim 1 : vector<1x512xf32>, i32 -> vector<1x512xf32>
    %c3 = arith.constant 3 : index
    %c0_12 = arith.constant 0 : index
    %c0_13 = arith.constant 0 : index
    %33 = vector.load %arg2[%c3, %c0_12, %c0_13] : memref<9x1x512xf32, #tpu.memory_space<vmem>>, vector<1x1x512xf32>
    %34 = vector.shape_cast %33 : vector<1x1x512xf32> to vector<1x512xf32>
    %35 = arith.mulf %32, %34 : vector<1x512xf32>
    %36 = vector.broadcast %31 : vector<16x1xf32> to vector<16x512xf32>
    %37 = vector.broadcast %35 : vector<1x512xf32> to vector<16x512xf32>
    %38 = arith.mulf %36, %37 : vector<16x512xf32>
    %39 = arith.addf %30, %38 : vector<16x512xf32>
    %40 = vector.extract_strided_slice %0 {offsets = [0, 4], sizes = [16, 1], strides = [1, 1]} : vector<16x9xf32> to vector<16x1xf32>
    %41 = vector.broadcast %40 : vector<16x1xf32> to vector<16x512xf32>
    %42 = vector.broadcast %2 : vector<1x512xf32> to vector<16x512xf32>
    %43 = arith.mulf %41, %42 : vector<16x512xf32>
    %44 = arith.addf %39, %43 : vector<16x512xf32>
    %45 = vector.extract_strided_slice %0 {offsets = [0, 5], sizes = [16, 1], strides = [1, 1]} : vector<16x9xf32> to vector<16x1xf32>
    %c511_i32 = arith.constant 511 : i32
    %46 = tpu.dynamic_rotate %2 by %c511_i32 dim 1 : vector<1x512xf32>, i32 -> vector<1x512xf32>
    %c5 = arith.constant 5 : index
    %c0_14 = arith.constant 0 : index
    %c0_15 = arith.constant 0 : index
    %47 = vector.load %arg2[%c5, %c0_14, %c0_15] : memref<9x1x512xf32, #tpu.memory_space<vmem>>, vector<1x1x512xf32>
    %48 = vector.shape_cast %47 : vector<1x1x512xf32> to vector<1x512xf32>
    %49 = arith.mulf %46, %48 : vector<1x512xf32>
    %50 = vector.broadcast %45 : vector<16x1xf32> to vector<16x512xf32>
    %51 = vector.broadcast %49 : vector<1x512xf32> to vector<16x512xf32>
    %52 = arith.mulf %50, %51 : vector<16x512xf32>
    %53 = arith.addf %44, %52 : vector<16x512xf32>
    %54 = vector.extract_strided_slice %0 {offsets = [0, 6], sizes = [16, 1], strides = [1, 1]} : vector<16x9xf32> to vector<16x1xf32>
    %c497_i32 = arith.constant 497 : i32
    %55 = tpu.dynamic_rotate %2 by %c497_i32 dim 1 : vector<1x512xf32>, i32 -> vector<1x512xf32>
    %c6 = arith.constant 6 : index
    %c0_16 = arith.constant 0 : index
    %c0_17 = arith.constant 0 : index
    %56 = vector.load %arg2[%c6, %c0_16, %c0_17] : memref<9x1x512xf32, #tpu.memory_space<vmem>>, vector<1x1x512xf32>
    %57 = vector.shape_cast %56 : vector<1x1x512xf32> to vector<1x512xf32>
    %58 = arith.mulf %55, %57 : vector<1x512xf32>
    %59 = vector.broadcast %54 : vector<16x1xf32> to vector<16x512xf32>
    %60 = vector.broadcast %58 : vector<1x512xf32> to vector<16x512xf32>
    %61 = arith.mulf %59, %60 : vector<16x512xf32>
    %62 = arith.addf %53, %61 : vector<16x512xf32>
    %63 = vector.extract_strided_slice %0 {offsets = [0, 7], sizes = [16, 1], strides = [1, 1]} : vector<16x9xf32> to vector<16x1xf32>
    %c496_i32 = arith.constant 496 : i32
    %64 = tpu.dynamic_rotate %2 by %c496_i32 dim 1 : vector<1x512xf32>, i32 -> vector<1x512xf32>
    %c7 = arith.constant 7 : index
    %c0_18 = arith.constant 0 : index
    %c0_19 = arith.constant 0 : index
    %65 = vector.load %arg2[%c7, %c0_18, %c0_19] : memref<9x1x512xf32, #tpu.memory_space<vmem>>, vector<1x1x512xf32>
    %66 = vector.shape_cast %65 : vector<1x1x512xf32> to vector<1x512xf32>
    %67 = arith.mulf %64, %66 : vector<1x512xf32>
    %68 = vector.broadcast %63 : vector<16x1xf32> to vector<16x512xf32>
    %69 = vector.broadcast %67 : vector<1x512xf32> to vector<16x512xf32>
    %70 = arith.mulf %68, %69 : vector<16x512xf32>
    %71 = arith.addf %62, %70 : vector<16x512xf32>
    %72 = vector.extract_strided_slice %0 {offsets = [0, 8], sizes = [16, 1], strides = [1, 1]} : vector<16x9xf32> to vector<16x1xf32>
    %c495_i32 = arith.constant 495 : i32
    %73 = tpu.dynamic_rotate %2 by %c495_i32 dim 1 : vector<1x512xf32>, i32 -> vector<1x512xf32>
    %c8 = arith.constant 8 : index
    %c0_20 = arith.constant 0 : index
    %c0_21 = arith.constant 0 : index
    %74 = vector.load %arg2[%c8, %c0_20, %c0_21] : memref<9x1x512xf32, #tpu.memory_space<vmem>>, vector<1x1x512xf32>
    %75 = vector.shape_cast %74 : vector<1x1x512xf32> to vector<1x512xf32>
    %76 = arith.mulf %73, %75 : vector<1x512xf32>
    %77 = vector.broadcast %72 : vector<16x1xf32> to vector<16x512xf32>
    %78 = vector.broadcast %76 : vector<1x512xf32> to vector<16x512xf32>
    %79 = arith.mulf %77, %78 : vector<16x512xf32>
    %80 = arith.addf %71, %79 : vector<16x512xf32>
    %81 = vector.broadcast %1 : vector<16x1xf32> to vector<16x512xf32>
    %82 = arith.addf %80, %81 : vector<16x512xf32>
    %cst_22 = arith.constant 0.000000e+00 : f32
    %83 = vector.broadcast %cst_22 : f32 to vector<16x512xf32>
    %84 = arith.maximumf %82, %83 : vector<16x512xf32>
    %c0_23 = arith.constant 0 : index
    %c0_24 = arith.constant 0 : index
    %85 = vector.load %arg8[%c0_23, %c0_24] : memref<16x512xf32, #tpu.memory_space<vmem>>, vector<16x512xf32>
    tpu.vector_store %arg8[%c0_23, %c0_24], %84 {strides = array<i32>} : memref<16x512xf32, #tpu.memory_space<vmem>>, vector<16x512xf32>,
    %c0_25 = arith.constant 0 : index
    %c0_26 = arith.constant 0 : index
    %86 = vector.load %arg8[%c0_25, %c0_26] : memref<16x512xf32, #tpu.memory_space<vmem>>, vector<16x512xf32>
    %c17_i32_27 = arith.constant 17 : i32
    %87 = tpu.dynamic_rotate %86 by %c17_i32_27 dim 1 : vector<16x512xf32>, i32 -> vector<16x512xf32>
    %c0_28 = arith.constant 0 : index
    %c0_29 = arith.constant 0 : index
    %c0_30 = arith.constant 0 : index
    %88 = vector.load %arg2[%c0_28, %c0_29, %c0_30] : memref<9x1x512xf32, #tpu.memory_space<vmem>>, vector<1x1x512xf32>
    %89 = vector.shape_cast %88 : vector<1x1x512xf32> to vector<1x512xf32>
    %90 = vector.broadcast %89 : vector<1x512xf32> to vector<16x512xf32>
    %91 = arith.mulf %87, %90 : vector<16x512xf32>
    %c0_31 = arith.constant 0 : index
    %c0_32 = arith.constant 0 : index
    %92 = vector.load %arg9[%c0_31, %c0_32] : memref<144x512xf32, #tpu.memory_space<vmem>>, vector<16x512xf32>
    tpu.vector_store %arg9[%c0_31, %c0_32], %91 {strides = array<i32>} : memref<144x512xf32, #tpu.memory_space<vmem>>, vector<16x512xf32>,
    %c0_33 = arith.constant 0 : index
    %c0_34 = arith.constant 0 : index
    %93 = vector.load %arg8[%c0_33, %c0_34] : memref<16x512xf32, #tpu.memory_space<vmem>>, vector<16x512xf32>
    %c16_i32_35 = arith.constant 16 : i32
    %94 = tpu.dynamic_rotate %93 by %c16_i32_35 dim 1 : vector<16x512xf32>, i32 -> vector<16x512xf32>
    %c1_36 = arith.constant 1 : index
    %c0_37 = arith.constant 0 : index
    %c0_38 = arith.constant 0 : index
    %95 = vector.load %arg2[%c1_36, %c0_37, %c0_38] : memref<9x1x512xf32, #tpu.memory_space<vmem>>, vector<1x1x512xf32>
    %96 = vector.shape_cast %95 : vector<1x1x512xf32> to vector<1x512xf32>
    %97 = vector.broadcast %96 : vector<1x512xf32> to vector<16x512xf32>
    %98 = arith.mulf %94, %97 : vector<16x512xf32>
    %c16 = arith.constant 16 : index
    %c0_39 = arith.constant 0 : index
    %99 = vector.load %arg9[%c16, %c0_39] : memref<144x512xf32, #tpu.memory_space<vmem>>, vector<16x512xf32>
    tpu.vector_store %arg9[%c16, %c0_39], %98 {strides = array<i32>} : memref<144x512xf32, #tpu.memory_space<vmem>>, vector<16x512xf32>,
    %c0_40 = arith.constant 0 : index
    %c0_41 = arith.constant 0 : index
    %100 = vector.load %arg8[%c0_40, %c0_41] : memref<16x512xf32, #tpu.memory_space<vmem>>, vector<16x512xf32>
    %c15_i32_42 = arith.constant 15 : i32
    %101 = tpu.dynamic_rotate %100 by %c15_i32_42 dim 1 : vector<16x512xf32>, i32 -> vector<16x512xf32>
    %c2_43 = arith.constant 2 : index
    %c0_44 = arith.constant 0 : index
    %c0_45 = arith.constant 0 : index
    %102 = vector.load %arg2[%c2_43, %c0_44, %c0_45] : memref<9x1x512xf32, #tpu.memory_space<vmem>>, vector<1x1x512xf32>
    %103 = vector.shape_cast %102 : vector<1x1x512xf32> to vector<1x512xf32>
    %104 = vector.broadcast %103 : vector<1x512xf32> to vector<16x512xf32>
    %105 = arith.mulf %101, %104 : vector<16x512xf32>
    %c32 = arith.constant 32 : index
    %c0_46 = arith.constant 0 : index
    %106 = vector.load %arg9[%c32, %c0_46] : memref<144x512xf32, #tpu.memory_space<vmem>>, vector<16x512xf32>
    tpu.vector_store %arg9[%c32, %c0_46], %105 {strides = array<i32>} : memref<144x512xf32, #tpu.memory_space<vmem>>, vector<16x512xf32>,
    %c0_47 = arith.constant 0 : index
    %c0_48 = arith.constant 0 : index
    %107 = vector.load %arg8[%c0_47, %c0_48] : memref<16x512xf32, #tpu.memory_space<vmem>>, vector<16x512xf32>
    %c1_i32_49 = arith.constant 1 : i32
    %108 = tpu.dynamic_rotate %107 by %c1_i32_49 dim 1 : vector<16x512xf32>, i32 -> vector<16x512xf32>
    %c3_50 = arith.constant 3 : index
    %c0_51 = arith.constant 0 : index
    %c0_52 = arith.constant 0 : index
    %109 = vector.load %arg2[%c3_50, %c0_51, %c0_52] : memref<9x1x512xf32, #tpu.memory_space<vmem>>, vector<1x1x512xf32>
    %110 = vector.shape_cast %109 : vector<1x1x512xf32> to vector<1x512xf32>
    %111 = vector.broadcast %110 : vector<1x512xf32> to vector<16x512xf32>
    %112 = arith.mulf %108, %111 : vector<16x512xf32>
    %c48 = arith.constant 48 : index
    %c0_53 = arith.constant 0 : index
    %113 = vector.load %arg9[%c48, %c0_53] : memref<144x512xf32, #tpu.memory_space<vmem>>, vector<16x512xf32>
    tpu.vector_store %arg9[%c48, %c0_53], %112 {strides = array<i32>} : memref<144x512xf32, #tpu.memory_space<vmem>>, vector<16x512xf32>,
    %c0_54 = arith.constant 0 : index
    %c0_55 = arith.constant 0 : index
    %114 = vector.load %arg8[%c0_54, %c0_55] : memref<16x512xf32, #tpu.memory_space<vmem>>, vector<16x512xf32>
    %c64 = arith.constant 64 : index
    %c0_56 = arith.constant 0 : index
    %115 = vector.load %arg9[%c64, %c0_56] : memref<144x512xf32, #tpu.memory_space<vmem>>, vector<16x512xf32>
    tpu.vector_store %arg9[%c64, %c0_56], %114 {strides = array<i32>} : memref<144x512xf32, #tpu.memory_space<vmem>>, vector<16x512xf32>,
    %c0_57 = arith.constant 0 : index
    %c0_58 = arith.constant 0 : index
    %116 = vector.load %arg8[%c0_57, %c0_58] : memref<16x512xf32, #tpu.memory_space<vmem>>, vector<16x512xf32>
    %c511_i32_59 = arith.constant 511 : i32
    %117 = tpu.dynamic_rotate %116 by %c511_i32_59 dim 1 : vector<16x512xf32>, i32 -> vector<16x512xf32>
    %c5_60 = arith.constant 5 : index
    %c0_61 = arith.constant 0 : index
    %c0_62 = arith.constant 0 : index
    %118 = vector.load %arg2[%c5_60, %c0_61, %c0_62] : memref<9x1x512xf32, #tpu.memory_space<vmem>>, vector<1x1x512xf32>
    %119 = vector.shape_cast %118 : vector<1x1x512xf32> to vector<1x512xf32>
    %120 = vector.broadcast %119 : vector<1x512xf32> to vector<16x512xf32>
    %121 = arith.mulf %117, %120 : vector<16x512xf32>
    %c80 = arith.constant 80 : index
    %c0_63 = arith.constant 0 : index
    %122 = vector.load %arg9[%c80, %c0_63] : memref<144x512xf32, #tpu.memory_space<vmem>>, vector<16x512xf32>
    tpu.vector_store %arg9[%c80, %c0_63], %121 {strides = array<i32>} : memref<144x512xf32, #tpu.memory_space<vmem>>, vector<16x512xf32>,
    %c0_64 = arith.constant 0 : index
    %c0_65 = arith.constant 0 : index
    %123 = vector.load %arg8[%c0_64, %c0_65] : memref<16x512xf32, #tpu.memory_space<vmem>>, vector<16x512xf32>
    %c497_i32_66 = arith.constant 497 : i32
    %124 = tpu.dynamic_rotate %123 by %c497_i32_66 dim 1 : vector<16x512xf32>, i32 -> vector<16x512xf32>
    %c6_67 = arith.constant 6 : index
    %c0_68 = arith.constant 0 : index
    %c0_69 = arith.constant 0 : index
    %125 = vector.load %arg2[%c6_67, %c0_68, %c0_69] : memref<9x1x512xf32, #tpu.memory_space<vmem>>, vector<1x1x512xf32>
    %126 = vector.shape_cast %125 : vector<1x1x512xf32> to vector<1x512xf32>
    %127 = vector.broadcast %126 : vector<1x512xf32> to vector<16x512xf32>
    %128 = arith.mulf %124, %127 : vector<16x512xf32>
    %c96 = arith.constant 96 : index
    %c0_70 = arith.constant 0 : index
    %129 = vector.load %arg9[%c96, %c0_70] : memref<144x512xf32, #tpu.memory_space<vmem>>, vector<16x512xf32>
    tpu.vector_store %arg9[%c96, %c0_70], %128 {strides = array<i32>} : memref<144x512xf32, #tpu.memory_space<vmem>>, vector<16x512xf32>,
    %c0_71 = arith.constant 0 : index
    %c0_72 = arith.constant 0 : index
    %130 = vector.load %arg8[%c0_71, %c0_72] : memref<16x512xf32, #tpu.memory_space<vmem>>, vector<16x512xf32>
    %c496_i32_73 = arith.constant 496 : i32
    %131 = tpu.dynamic_rotate %130 by %c496_i32_73 dim 1 : vector<16x512xf32>, i32 -> vector<16x512xf32>
    %c7_74 = arith.constant 7 : index
    %c0_75 = arith.constant 0 : index
    %c0_76 = arith.constant 0 : index
    %132 = vector.load %arg2[%c7_74, %c0_75, %c0_76] : memref<9x1x512xf32, #tpu.memory_space<vmem>>, vector<1x1x512xf32>
    %133 = vector.shape_cast %132 : vector<1x1x512xf32> to vector<1x512xf32>
    %134 = vector.broadcast %133 : vector<1x512xf32> to vector<16x512xf32>
    %135 = arith.mulf %131, %134 : vector<16x512xf32>
    %c112 = arith.constant 112 : index
    %c0_77 = arith.constant 0 : index
    %136 = vector.load %arg9[%c112, %c0_77] : memref<144x512xf32, #tpu.memory_space<vmem>>, vector<16x512xf32>
    tpu.vector_store %arg9[%c112, %c0_77], %135 {strides = array<i32>} : memref<144x512xf32, #tpu.memory_space<vmem>>, vector<16x512xf32>,
    %c0_78 = arith.constant 0 : index
    %c0_79 = arith.constant 0 : index
    %137 = vector.load %arg8[%c0_78, %c0_79] : memref<16x512xf32, #tpu.memory_space<vmem>>, vector<16x512xf32>
    %c495_i32_80 = arith.constant 495 : i32
    %138 = tpu.dynamic_rotate %137 by %c495_i32_80 dim 1 : vector<16x512xf32>, i32 -> vector<16x512xf32>
    %c8_81 = arith.constant 8 : index
    %c0_82 = arith.constant 0 : index
    %c0_83 = arith.constant 0 : index
    %139 = vector.load %arg2[%c8_81, %c0_82, %c0_83] : memref<9x1x512xf32, #tpu.memory_space<vmem>>, vector<1x1x512xf32>
    %140 = vector.shape_cast %139 : vector<1x1x512xf32> to vector<1x512xf32>
    %141 = vector.broadcast %140 : vector<1x512xf32> to vector<16x512xf32>
    %142 = arith.mulf %138, %141 : vector<16x512xf32>
    %c128 = arith.constant 128 : index
    %c0_84 = arith.constant 0 : index
    %143 = vector.load %arg9[%c128, %c0_84] : memref<144x512xf32, #tpu.memory_space<vmem>>, vector<16x512xf32>
    tpu.vector_store %arg9[%c128, %c0_84], %142 {strides = array<i32>} : memref<144x512xf32, #tpu.memory_space<vmem>>, vector<16x512xf32>,
    %c0_85 = arith.constant 0 : index
    %c0_86 = arith.constant 0 : index
    %144 = vector.load %arg5[%c0_85, %c0_86] : memref<32x144xf32, #tpu.memory_space<vmem>>, vector<32x144xf32>
    %c0_87 = arith.constant 0 : index
    %c0_88 = arith.constant 0 : index
    %145 = vector.load %arg9[%c0_87, %c0_88] : memref<144x512xf32, #tpu.memory_space<vmem>>, vector<144x512xf32>
    %cst_89 = arith.constant dense<0.000000e+00> : vector<32x512xf32>
    %146 = tpu.matmul %144, %145, %cst_89 {dimension_numbers = #tpu.dot_dimension_numbers<[1], [0], [0], [1], [0, 0, 1, 1], [], []>} : vector<32x144xf32>, vector<144x512xf32>, vector<32x512xf32> -> vector<32x512xf32>
    %c0_90 = arith.constant 0 : index
    %c0_91 = arith.constant 0 : index
    %147 = vector.load %arg6[%c0_90, %c0_91] : memref<32x1xf32, #tpu.memory_space<vmem>>, vector<32x1xf32>
    %148 = vector.broadcast %147 : vector<32x1xf32> to vector<32x512xf32>
    %149 = arith.addf %146, %148 : vector<32x512xf32>
    %cst_92 = arith.constant 0.000000e+00 : f32
    %150 = vector.broadcast %cst_92 : f32 to vector<32x512xf32>
    %151 = arith.maximumf %149, %150 : vector<32x512xf32>
    %152 = vector.extract_strided_slice %151 {offsets = [0, 0], sizes = [32, 256], strides = [1, 1]} : vector<32x512xf32> to vector<32x256xf32>
    %c0_93 = arith.constant 0 : index
    %c0_94 = arith.constant 0 : index
    %c0_95 = arith.constant 0 : index
    %153 = vector.load %arg7[%c0_93, %c0_94, %c0_95] : memref<2x32x256xf32, #tpu.memory_space<vmem>>, vector<1x32x256xf32>
    %154 = vector.shape_cast %153 : vector<1x32x256xf32> to vector<32x256xf32>
    %155 = vector.shape_cast %152 : vector<32x256xf32> to vector<1x32x256xf32>
    tpu.vector_store %arg7[%c0_93, %c0_94, %c0_95], %155 {strides = array<i32>} : memref<2x32x256xf32, #tpu.memory_space<vmem>>, vector<1x32x256xf32>,
    %156 = vector.extract_strided_slice %151 {offsets = [0, 256], sizes = [32, 256], strides = [1, 1]} : vector<32x512xf32> to vector<32x256xf32>
    %c1_96 = arith.constant 1 : index
    %c0_97 = arith.constant 0 : index
    %c0_98 = arith.constant 0 : index
    %157 = vector.load %arg7[%c1_96, %c0_97, %c0_98] : memref<2x32x256xf32, #tpu.memory_space<vmem>>, vector<1x32x256xf32>
    %158 = vector.shape_cast %157 : vector<1x32x256xf32> to vector<32x256xf32>
    %159 = vector.shape_cast %156 : vector<32x256xf32> to vector<1x32x256xf32>
    tpu.vector_store %arg7[%c1_96, %c0_97, %c0_98], %159 {strides = array<i32>} : memref<2x32x256xf32, #tpu.memory_space<vmem>>, vector<1x32x256xf32>,
    return
  }
  func.func @transform_0(%arg0: i32) -> (i32, i32) {
    %c0_i32 = arith.constant 0 : i32
    %c0_i32_0 = arith.constant 0 : i32
    return %c0_i32, %arg0 : i32, i32
  }
  func.func @transform_1(%arg0: i32) -> (i32, i32, i32) {
    %c0_i32 = arith.constant 0 : i32
    %c0_i32_0 = arith.constant 0 : i32
    %c0_i32_1 = arith.constant 0 : i32
    %c0_i32_2 = arith.constant 0 : i32
    return %c0_i32, %c0_i32_0, %c0_i32_1 : i32, i32, i32
  }
  func.func @transform_2(%arg0: i32) -> (i32, i32) {
    %c0_i32 = arith.constant 0 : i32
    %c0_i32_0 = arith.constant 0 : i32
    %c0_i32_1 = arith.constant 0 : i32
    return %c0_i32, %c0_i32_0 : i32, i32
  }
  func.func @transform_3(%arg0: i32) -> (i32, i32) {
    %c0_i32 = arith.constant 0 : i32
    %c0_i32_0 = arith.constant 0 : i32
    %c0_i32_1 = arith.constant 0 : i32
    return %c0_i32, %c0_i32_0 : i32, i32
  }
  func.func @transform_4(%arg0: i32) -> (i32, i32) {
    %c0_i32 = arith.constant 0 : i32
    %c0_i32_0 = arith.constant 0 : i32
    %c0_i32_1 = arith.constant 0 : i32
    return %c0_i32, %c0_i32_0 : i32, i32
  }
  func.func @transform_5(%arg0: i32) -> (i32, i32) {
    %c0_i32 = arith.constant 0 : i32
    %c0_i32_0 = arith.constant 0 : i32
    %c0_i32_1 = arith.constant 0 : i32
    return %c0_i32, %c0_i32_0 : i32, i32
  }
  func.func @transform_6(%arg0: i32) -> (i32, i32, i32) {
    %c0_i32 = arith.constant 0 : i32
    %c0_i32_0 = arith.constant 0 : i32
    %c0_i32_1 = arith.constant 0 : i32
    return %arg0, %c0_i32, %c0_i32_0 : i32, i32, i32
  }
}

</mosaic_0001>

<bundles_post_ra>
// kernel: feature_extractor.1
= control target key start
LH: loop header
LB: loop body
LE: loop exit
PB: predicated region body
PF: predicated region fallthrough
CT: control target
= control target key end

     0   :  { %v29_v0 = vlaneseq  ;;  %v1723_v1 = vmov 1   ;;  %v1724_v2 = vmov 0   ;;  %s1725_s23 = smov 17   ;;  %s1727_s26 = smov 15   ;;  %v1728_v15 = vmov 2   ;;  %s2864_s0 = inlined_call_operand.vmem [shape: f32[1,512], index: 0, kind: input, shape index: {}]   ;;  %s2865_s2 = inlined_call_operand.vmem [shape: f32[16,9], index: 2, kind: input, shape index: {}]   ;;  %s2866_s3 = inlined_call_operand.vmem [shape: f32[16,1], index: 3, kind: input, shape index: {}]   ;;  %s2867_s1 = inlined_call_operand.vmem [shape: f32[9,1,512], index: 1, kind: input, shape index: {}]   ;;  %s2868_s4 = inlined_call_operand.vmem [shape: f32[32,144], index: 4, kind: input, shape index: {}]   ;;  %s2869_s5 = inlined_call_operand.vmem [shape: f32[32,1], index: 5, kind: input, shape index: {}]   ;;  %s2870_s6 = inlined_call_operand.vmem [shape: f32[2,32,256], index: 6, kind: output, shape index: {}]  }
   0x1   :  { %1705 = vset.pattern.permute.xlu0 %v1723_v1  ;;  %1706 = vset.pattern.permute.xlu1 %v1724_v2  ;;  %v27_v4 = vld [vmem:[%s2864_s0] sm:$0xf]  ;;  %s1726_s0 = smov 16   ;;  %v1815_v13 = vld [vmem:[%s2865_s2 + $0x8] sm:$0xff]  ;;  %s1729_s29 = smov 1   ;;  %v1730_v16 = vmov 3  }
   0x2   :  { %v30_v3 = vshrl.u32 %v29_v0, 7  ;;  %v23_v14 = vld [vmem:[%s2865_s2] sm:$0xff]  ;;  %s1731_s2 = smov 127   ;;  %v1732_v17 = vmov 5   ;;  %s1733_s30 = smov 113   ;;  %v1734_v18 = vmov 4  }
   0x3   :  { %v1735_v19 = vmov 6   ;;  %s1736_s7 = smov 112   ;;  %v1737_v20 = vmov 7   ;;  %s1738_s8 = smov 111   ;;  %v1739_v21 = vmov 8   ;;  %v26_v22 = vld [vmem:[%s2866_s3 + $0x8] sm:$0xff] }
   0x4   :  { %v1780_v5 = vsub.s32 0, %v30_v3  ;;  %v1782_v6 = vsub.s32 2, %v30_v3  ;;  %v1784_v7 = vsub.s32 3, %v30_v3  ;;  %v1786_v8 = vsub.s32 1, %v30_v3  ;;  %v25_v24 = vld [vmem:[%s2866_s3] sm:$0xff] }
   0x5   :  { %v1940_v50 = vand.u32 127, %v29_v0  ;;  %v1945_v51 = vld [vmem:[%s2867_s1] sm:$0xf]  ;;  %v1950_v52 = vld [vmem:[%s2867_s1 + $0x4] sm:$0xf]  ;;  %vm1430_vm8 = vcmask 130048  }
   0x6   :  { %v1789_v9 = vrot.slane %v27_v4, %v1782_v6  ;;  %v1792_v10 = vrot.slane %v27_v4, %v1780_v5  ;;  %v1799_v11 = vrot.slane %v27_v4, %v1784_v7  ;;  %v1802_v12 = vrot.slane %v27_v4, %v1786_v8  ;;  %v1957_v54 = vld [vmem:[%s2867_s1 + $0x8] sm:$0xf]  ;;  %v1976_v61 = vld [vmem:[%s2867_s1 + $0xc] sm:$0xf]  ;;  %v1991_v3 = vld [vmem:[%s2867_s1 + $0x14] sm:$0xf] }
   0x7   :  { %vm59_vm0 = vcmp.lt.s32.totalorder %v1940_v50, 17  ;;  %v69_v55 = vrot.slane %v1945_v51, %v1780_v5  ;;  %v81_v56 = vrot.slane %v1945_v51, %v1784_v7  ;;  %v73_v58 = vrot.slane %v1945_v51, %v1786_v8 }
   0x8   :  { %53 = vrot.lane.b32.xlu1 %v1789_v9, %s1725_s23  ;;  %49 = vrot.lane.b32.xlu0 %v1792_v10, %s1725_s23  ;;  %v77_v59 = vrot.slane %v1945_v51, %v1782_v6  ;;  %vm140_vm1 = vcmp.lt.s32.totalorder %v1940_v50, 16  ;;  %v155_v60 = vrot.slane %v1950_v52, %v1786_v8  ;;  %v159_v62 = vrot.slane %v1950_v52, %v1782_v6 }
   0x9   :  { %v151_v63 = vrot.slane %v1950_v52, %v1780_v5  ;;  %v163_v0 = vrot.slane %v1950_v52, %v1784_v7  ;;  %vm220_vm2 = vcmp.lt.s32.totalorder %v1940_v50, 15  ;;  %vm300_vm3 = vcmp.lt.s32.totalorder %v1940_v50, 1 }
   0xa   :  { %vm404_vm4 = vcmp.lt.s32.totalorder %v1940_v50, 127  ;;  %vm484_vm5 = vcmp.lt.s32.totalorder %v1940_v50, 113  ;;  %vm564_vm6 = vcmp.lt.s32.totalorder %v1940_v50, 112  ;;  %vm644_vm7 = vcmp.lt.s32.totalorder %v1940_v50, 111  ;;  %v1328_v50 = vld [vmem:[%s2868_s4 + $0x10] sm:$0xff] }
   0xc   :  { %55 = vrot.lane.b32.xlu1 %v1799_v11, %s1725_s23  ;;  %51 = vrot.lane.b32.xlu0 %v1802_v12, %s1725_s23 }
  0x10   :  { %132 = vrot.lane.b32.xlu1 %v1792_v10, %s1726_s0  ;;  %136 = vrot.lane.b32.xlu0 %v1789_v9, %s1726_s0 }
  0x14   :  { %134 = vrot.lane.b32.xlu1 %v1802_v12, %s1726_s0  ;;  %177 = vperm.xlu0 %1705, %v1815_v13  }
  0x18   :  { %138 = vrot.lane.b32.xlu1 %v1799_v11, %s1726_s0  ;;  %212 = vrot.lane.b32.xlu0 %v1792_v10, %s1727_s26 }
  0x19   :  { %1708 = vset.pattern.permute.xlu0 %v1728_v15 }
  0x1c   :  { %92 = vperm.xlu1 %1706, %v23_v14   ;;  %216 = vrot.lane.b32.xlu0 %v1789_v9, %s1727_s26 }
  0x20   :  { %1707 = vset.pattern.permute.xlu1 %v1723_v1  ;;  %257 = vperm.xlu0 %1708, %v1815_v13  }
  0x21   :  { %173 = vperm.xlu1 %1707, %v23_v14  }
  0x24   :  { %294 = vrot.lane.b32.xlu0 %v1802_v12, %s1729_s29 }
  0x25   :  { %214 = vrot.lane.b32.xlu1 %v1802_v12, %s1727_s26  ;;  %1711 = vset.pattern.permute.xlu0 %v1730_v16 }
  0x26   :  { %1709 = vset.pattern.permute.xlu1 %v1728_v15  ;;  %v2004_v15 = vld [vmem:[%s2867_s1 + $0x18] sm:$0xf] }
  0x28   :  { %298 = vrot.lane.b32.xlu0 %v1799_v11, %s1729_s29 }
  0x29   :  { %218 = vrot.lane.b32.xlu1 %v1799_v11, %s1727_s26 }
  0x2c   :  { %333 = vperm.xlu0 %1711, %v23_v14  }
  0x2d   :  { %253 = vperm.xlu1 %1709, %v23_v14  }
  0x30   :  { %396 = vrot.lane.b32.xlu0 %v1792_v10, %s1731_s2 }
  0x31   :  { %292 = vrot.lane.b32.xlu1 %v1792_v10, %s1729_s29  ;;  %1713 = vset.pattern.permute.xlu0 %v1732_v17 }
  0x32   :  { %1710 = vset.pattern.permute.xlu1 %v1730_v16 }
  0x34   :  { %400 = vrot.lane.b32.xlu0 %v1789_v9, %s1731_s2 }
  0x35   :  { %296 = vrot.lane.b32.xlu1 %v1789_v9, %s1729_s29 }
  0x38   :  { %441 = vperm.xlu0 %1713, %v1815_v13  }
  0x39   :  { %337 = vperm.xlu1 %1710, %v1815_v13  }
  0x3c   :  { %478 = vrot.lane.b32.xlu0 %v1802_v12, %s1733_s30 }
  0x3d   :  { %1712 = vset.pattern.permute.xlu1 %v1734_v18  ;;  %1716 = vset.pattern.permute.xlu0 %v1735_v19 }
  0x3e   :  { %377 = vperm.xlu1 %1712, %v1815_v13  }
  0x40   :  { %482 = vrot.lane.b32.xlu0 %v1799_v11, %s1733_s30 }
  0x42   :  { %373 = vperm.xlu1 %1712, %v23_v14  }
  0x44   :  { %517 = vperm.xlu0 %1716, %v23_v14  }
  0x46   :  { %398 = vrot.lane.b32.xlu1 %v1802_v12, %s1731_s2 }
  0x47   :  { %1714 = vset.pattern.permute.xlu1 %v1732_v17 }
  0x48   :  { %560 = vrot.lane.b32.xlu0 %v1789_v9, %s1736_s7 }
  0x49   :  { %1717 = vset.pattern.permute.xlu0 %v1737_v20 }
  0x4a   :  { %402 = vrot.lane.b32.xlu1 %v1799_v11, %s1731_s2 }
  0x4c   :  { %601 = vperm.xlu0 %1717, %v1815_v13  }
  0x4e   :  { %437 = vperm.xlu1 %1714, %v23_v14  }
  0x50   :  { %638 = vrot.lane.b32.xlu0 %v1802_v12, %s1738_s8 }
  0x51   :  { %1720 = vset.pattern.permute.xlu0 %v1739_v21 }
  0x52   :  { %476 = vrot.lane.b32.xlu1 %v1792_v10, %s1733_s30 }
  0x53   :  { %1715 = vset.pattern.permute.xlu1 %v1735_v19 }
  0x54   :  { %642 = vrot.lane.b32.xlu0 %v1799_v11, %s1738_s8 }
  0x56   :  { %480 = vrot.lane.b32.xlu1 %v1789_v9, %s1733_s30 }
  0x58   :  { %677 = vperm.xlu0 %1720, %v23_v14  }
  0x5a   :  { %521 = vperm.xlu1 %1715, %v1815_v13  }
  0x5c   :  { %1721 = vset.pattern.permute.xlu0 %v1724_v2 }
  0x5d   :  { %97 = vperm.xlu0 %1721, %v1815_v13  }
  0x5e   :  { %556 = vrot.lane.b32.xlu1 %v1792_v10, %s1736_s7 }
  0x5f   :  { %1718 = vset.pattern.permute.xlu1 %v1737_v20 }
  0x62   :  { %558 = vrot.lane.b32.xlu1 %v1802_v12, %s1736_s7 }
  0x66   :  { %562 = vrot.lane.b32.xlu1 %v1799_v11, %s1736_s7 }
  0x6a   :  { %597 = vperm.xlu1 %1718, %v23_v14   ;;  %v2054_v14 = vld [vmem:[%s2867_s1 + $0x20] sm:$0xf] }
  0x6b   :  { %2883 = vst [vmem:[#allocation6_spill] sm:$0xff] %v2054_v14 }
  0x6e   :  { %636 = vrot.lane.b32.xlu1 %v1792_v10, %s1738_s8 }
  0x6f   :  { %1719 = vset.pattern.permute.xlu1 %v1739_v21  ;;  %v2019_v21 = vld [vmem:[%s2867_s1 + $0x1c] sm:$0xf] }
  0x70   :  { %2881 = vst [vmem:[#allocation4_spill] sm:$0xff] %v2019_v21 }
  0x72   :  { %640 = vrot.lane.b32.xlu1 %v1789_v9, %s1738_s8 }
  0x76   :  { %681 = vperm.xlu1 %1719, %v1815_v13   ;;  %v231_v13 = vrot.slane %v1957_v54, %v1780_v5 }
  0x7a   :  { %1722 = vset.pattern.permute.xlu1 %v1724_v2  ;;  %v1886_v23 = vpop.permute.xlu1 %53  ;;  %v1891_v25 = vpop.permute.xlu0 %49 }
  0x7b   :  { %723 = vperm.xlu1 %1722, %v26_v22  }
  0x7e   :  { %v56_v26 = vpop.permute.xlu1 %55  ;;  %v1893_v27 = vpop.permute.xlu0 %51 }
  0x7f   :  { %718 = vperm.xlu1 %1722, %v25_v24   ;;  %v63_v22 = vsel %vm59_vm0, %v56_v26, %v1891_v25  ;;  %v60_v19 = vsel %vm59_vm0, %v1886_v23, %v56_v26  ;;  %v62_v52 = vsel %vm59_vm0, %v1891_v25, %v1893_v27 }
  0x80   :  { %v86_v24 = vmul.f32 %v69_v55, %v63_v22  ;;  %v89_v17 = vmul.f32 %v81_v56, %v60_v19  ;;  %v87_v16 = vmul.f32 %v73_v58, %v62_v52 }
  0x82   :  { %v1895_v28 = vpop.permute.xlu1 %132  ;;  %v1897_v29 = vpop.permute.xlu0 %136  ;;  %v2101_v58 = vrot.slane %v86_v24, %v1780_v5 }
  0x86   :  { %v1899_v30 = vpop.permute.xlu1 %134 }
  0x87   :  { %v143_v51 = vsel %vm140_vm1, %v1895_v28, %v1899_v30  ;;  %v142_v55 = vsel %vm140_vm1, %v1899_v30, %v1897_v29 }
  0x8a   :  { %v1903_v32 = vpop.permute.xlu1 %138 }
  0x8b   :  { %v144_v18 = vsel %vm140_vm1, %v1903_v32, %v1895_v28  ;;  %v141_v25 = vsel %vm140_vm1, %v1897_v29, %v1903_v32  ;;  %v61_v28 = vsel %vm59_vm0, %v1893_v27, %v1886_v23  ;;  %v170_v23 = vmul.f32 %v159_v62, %v142_v55 }
  0x8c   :  { %v168_v22 = vmul.f32 %v151_v63, %v144_v18  ;;  %v171_v27 = vmul.f32 %v163_v0, %v141_v25  ;;  %v2126_v55 = vrot.slane %v87_v16, %v1780_v5 }
  0x8e   :  { %v183_v62 = vrot.slane %v168_v22, %v1780_v5  ;;  %v191_v22 = vrot.slane %v170_v23, %v1780_v5 }
  0x8f   :  { %v1901_v31 = vpop.permute.xlu0 %177 }
  0x93   :  { %v1905_v33 = vpop.permute.xlu0 %212 }
  0x97   :  { %v1907_v34 = vpop.permute.xlu1 %92  ;;  %v1909_v35 = vpop.permute.xlu0 %216 }
  0x9b   :  { %v1911_v36 = vpop.permute.xlu0 %257 }
  0x9c   :  { %v1913_v37 = vpop.permute.xlu1 %173 }
  0x9f   :  { %v1915_v38 = vpop.permute.xlu0 %294 }
  0xa0   :  { %v1917_v39 = vpop.permute.xlu1 %214 }
  0xa1   :  { %v223_v0 = vsel %vm220_vm2, %v1905_v33, %v1917_v39 }
  0xa3   :  { %v1919_v40 = vpop.permute.xlu0 %298 }
  0xa4   :  { %v1921_v41 = vpop.permute.xlu1 %218 }
  0xa5   :  { %v224_v63 = vsel %vm220_vm2, %v1921_v41, %v1905_v33  ;;  %v221_v52 = vsel %vm220_vm2, %v1909_v35, %v1921_v41  ;;  %v222_v41 = vsel %vm220_vm2, %v1917_v39, %v1909_v35  ;;  %v2887_v35 = vrot.slane %v1957_v54, %v1786_v8 }
  0xa6   :  { %v248_v25 = vmul.f32 %v231_v13, %v224_v63  ;;  %v2888_v13 = vrot.slane %v1957_v54, %v1784_v7 }
  0xa7   :  { %v1923_v42 = vpop.permute.xlu0 %333  ;;  %v249_v39 = vmul.f32 %v2887_v35, %v223_v0 }
  0xa8   :  { %v1925_v43 = vpop.permute.xlu1 %253  ;;  %v251_v23 = vmul.f32 %v2888_v13, %v221_v52  ;;  %v2891_v52 = vrot.slane %v1957_v54, %v1782_v6  ;;  %v2173_v13 = vmul.f32 %v191_v22, %v1901_v31  ;;  %v116_v54 = vmul.f32 %v2101_v58, %v1907_v34 }
  0xaa   :  { %v250_v35 = vmul.f32 %v2891_v52, %v222_v41  ;;  %v196_v41 = vmul.f32 %v183_v62, %v1913_v37 }
  0xab   :  { %v1927_v44 = vpop.permute.xlu0 %396 }
  0xac   :  { %v1929_v45 = vpop.permute.xlu1 %292 }
  0xad   :  { %v303_v24 = vsel %vm300_vm3, %v1929_v45, %v1915_v38 }
  0xaf   :  { %v1931_v46 = vpop.permute.xlu0 %400 }
  0xb0   :  { %v1933_v47 = vpop.permute.xlu1 %296 }
  0xb3   :  { %v1935_v48 = vpop.permute.xlu0 %441 }
  0xb4   :  { %v1937_v49 = vpop.permute.xlu1 %337 }
  0xb7   :  { %v1952_v53 = vpop.permute.xlu0 %478 }
  0xb9   :  { %v1964_v57 = vpop.permute.xlu1 %377 }
  0xbb   :  { %v1986_v2 = vpop.permute.xlu0 %482 }
  0xbd   :  { %v2014_v20 = vpop.permute.xlu1 %373 }
  0xbf   :  { %v2037_v4 = vpop.permute.xlu0 %517 }
  0xc0   :  { %2882 = vst [vmem:[#allocation5_spill] sm:$0xff] %v2037_v4  ;;  %v169_v4 = vmul.f32 %v155_v60, %v143_v51  ;;  %v2104_v60 = vrot.slane %v89_v17, %v1780_v5  ;;  %v88_v51 = vmul.f32 %v77_v59, %v61_v28  ;;  %v304_v59 = vsel %vm300_vm3, %v1919_v40, %v1929_v45 }
  0xc1   :  { %v2064_v26 = vpop.permute.xlu1 %398  ;;  %v195_v28 = vrot.slane %v171_v27, %v1780_v5  ;;  %v301_v45 = vsel %vm300_vm3, %v1933_v47, %v1919_v40  ;;  %v2889_v27 = vrot.slane %v1976_v61, %v1780_v5  ;;  %v2890_v40 = vrot.slane %v1976_v61, %v1786_v8 }
  0xc2   :  { %v187_v33 = vrot.slane %v169_v4, %v1780_v5  ;;  %v302_v4 = vsel %vm300_vm3, %v1915_v38, %v1933_v47  ;;  %v2159_v38 = vrot.slane %v88_v51, %v1780_v5  ;;  %v2162_v47 = vmul.f32 %v183_v62, %v1901_v31 }
  0xc3   :  { %v2080_v1 = vpop.permute.xlu0 %560  ;;  %v328_v63 = vmul.f32 %v2889_v27, %v304_v59  ;;  %v329_v30 = vmul.f32 %v2890_v40, %v303_v24  ;;  %v263_v24 = vrot.slane %v248_v25, %v1780_v5  ;;  %v2893_v51 = vrot.slane %v1976_v61, %v1782_v6 }
  0xc4   :  { %2884 = vst [vmem:[#allocation7_spill] sm:$0xff] %v2080_v1  ;;  %v2165_v0 = vmul.f32 %v187_v33, %v1901_v31  ;;  %v2894_v40 = vrot.slane %v1976_v61, %v1784_v7  ;;  %v2183_v29 = vmul.f32 %v195_v28, %v1901_v31  ;;  %v197_v52 = vmul.f32 %v187_v33, %v1913_v37 }
  0xc5   :  { %v2096_v18 = vpop.permute.xlu1 %402  ;;  %v330_v27 = vmul.f32 %v2893_v51, %v302_v4  ;;  %v267_v25 = vrot.slane %v249_v39, %v1780_v5  ;;  %v275_v4 = vrot.slane %v251_v23, %v1780_v5  ;;  %v343_v51 = vrot.slane %v328_v63, %v1780_v5 }
  0xc6   :  { %v331_v32 = vmul.f32 %v2894_v40, %v301_v45  ;;  %v347_v61 = vrot.slane %v329_v30, %v1780_v5  ;;  %v117_v31 = vmul.f32 %v2126_v55, %v1907_v34  ;;  %v198_v45 = vmul.f32 %v191_v22, %v1913_v37 }
  0xc7   :  { %v2123_v17 = vpop.permute.xlu0 %601  ;;  %v199_v40 = vmul.f32 %v195_v28, %v1913_v37  ;;  %v271_v62 = vrot.slane %v250_v35, %v1780_v5  ;;  %v276_v19 = vmul.f32 %v263_v24, %v1925_v43  ;;  %v277_v39 = vmul.f32 %v267_v25, %v1925_v43 }
  0xc8   :  { %2885 = vst [vmem:[#allocation8_spill] sm:$0xff] %v2123_v17  ;;  %v351_v23 = vrot.slane %v330_v27, %v1780_v5  ;;  %v355_v63 = vrot.slane %v331_v32, %v1780_v5  ;;  %v118_v30 = vmul.f32 %v2159_v38, %v1907_v34  ;;  %v119_v22 = vmul.f32 %v2104_v60, %v1907_v34 }
  0xc9   :  { %v2143_v16 = vpop.permute.xlu1 %437  ;;  %v204_v17 = vadd.f32 %v196_v41, %v116_v54  ;;  %v205_v37 = vadd.f32 %v197_v52, %v117_v31  ;;  %v278_v35 = vmul.f32 %v271_v62, %v1925_v43  ;;  %v279_v14 = vmul.f32 %v275_v4, %v1925_v43 }
  0xca   :  { %2886 = vst [vmem:[#allocation9_spill] sm:$0xff] %v2143_v16  ;;  %v357_v27 = vmul.f32 %v347_v61, %v1923_v42  ;;  %v207_v32 = vadd.f32 %v199_v40, %v119_v22  ;;  %v281_v21 = vmul.f32 %v267_v25, %v1911_v36  ;;  %v2218_v1 = vmul.f32 %v271_v62, %v1911_v36 }
  0xcb   :  { %v2170_v59 = vpop.permute.xlu0 %638  ;;  %v284_v54 = vadd.f32 %v276_v19, %v204_v17  ;;  %v285_v41 = vadd.f32 %v277_v39, %v205_v37  ;;  %v358_v52 = vmul.f32 %v351_v23, %v1923_v42  ;;  %v359_v31 = vmul.f32 %v355_v63, %v1923_v42 }
  0xcc   :  { %2892 = vst [vmem:[#allocation10_spill] sm:$0xff] %v2170_v59  ;;  %v206_v59 = vadd.f32 %v198_v45, %v118_v30  ;;  %v280_v43 = vmul.f32 %v263_v24, %v1911_v36  ;;  %v283_v16 = vmul.f32 %v275_v4, %v1911_v36  ;;  %v406_v25 = vsel %vm404_vm4, %v2064_v26, %v1931_v46 }
  0xcd   :  { %v2189_v56 = vpop.permute.xlu1 %476  ;;  %v407_v45 = vsel %vm404_vm4, %v1927_v44, %v2064_v26  ;;  %v365_v24 = vadd.f32 %v357_v27, %v285_v41  ;;  %v360_v36 = vmul.f32 %v343_v51, %v1937_v49  ;;  %v361_v4 = vmul.f32 %v347_v61, %v1937_v49 }
  0xce   :  { %v286_v17 = vadd.f32 %v278_v35, %v206_v59  ;;  %v2240_v62 = vmul.f32 %v351_v23, %v1937_v49  ;;  %v363_v39 = vmul.f32 %v355_v63, %v1937_v49  ;;  %v2896_v26 = vrot.slane %v1991_v3, %v1780_v5 }
  0xcf   :  { %v2200_v33 = vpop.permute.xlu0 %642  ;;  %v408_v49 = vsel %vm404_vm4, %v2096_v18, %v1927_v44  ;;  %v384_v35 = vmul.f32 %v1964_v57, %v1792_v10  ;;  %v380_v27 = vmul.f32 %v2014_v20, %v1792_v10  ;;  %v381_v44 = vmul.f32 %v2014_v20, %v1802_v12 }
  0xd0   :  { %2895 = vst [vmem:[#allocation11_spill] sm:$0xff] %v2200_v33  ;;  %v356_v33 = vmul.f32 %v343_v51, %v1923_v42  ;;  %v287_v42 = vadd.f32 %v279_v14, %v207_v32  ;;  %v366_v30 = vadd.f32 %v358_v52, %v286_v17  ;;  %v432_v37 = vmul.f32 %v2896_v26, %v407_v45 }
  0xd1   :  { %v2210_v28 = vpop.permute.xlu1 %480  ;;  %v2897_v14 = vrot.slane %v1991_v3, %v1786_v8  ;;  %v405_v51 = vsel %vm404_vm4, %v1931_v46, %v2096_v18  ;;  %v382_v18 = vmul.f32 %v2014_v20, %v1789_v9  ;;  %v383_v10 = vmul.f32 %v2014_v20, %v1799_v11 }
  0xd2   :  { %v364_v40 = vadd.f32 %v356_v33, %v284_v54  ;;  %v367_v22 = vadd.f32 %v359_v31, %v287_v42  ;;  %v385_v54 = vmul.f32 %v1964_v57, %v1802_v12  ;;  %v2899_v41 = vrot.slane %v1991_v3, %v1784_v7 }
  0xd3   :  { %v2220_v34 = vpop.permute.xlu0 %677  ;;  %v433_v59 = vmul.f32 %v2897_v14, %v406_v25  ;;  %v386_v31 = vmul.f32 %v1964_v57, %v1789_v9  ;;  %v387_v20 = vmul.f32 %v1964_v57, %v1799_v11  ;;  %v2294_v26 = vadd.f32 %v382_v18, %v366_v30 }
  0xd4   :  { %v435_v52 = vmul.f32 %v2899_v41, %v408_v49  ;;  %v2289_v45 = vadd.f32 %v380_v27, %v364_v40  ;;  %v486_v9 = vsel %vm484_vm5, %v1952_v53, %v2210_v28  ;;  %v2302_v11 = vadd.f32 %v383_v10, %v367_v22  ;;  %v2906_v41 = vld [vmem:[#allocation4_spill] sm:$0xff] }
  0xd5   :  { %v2235_v19 = vpop.permute.xlu1 %521  ;;  %v487_v57 = vsel %vm484_vm5, %v2189_v56, %v1952_v53  ;;  %v485_v30 = vsel %vm484_vm5, %v2210_v28, %v1986_v2  ;;  %v2900_v53 = vrot.slane %v2004_v15, %v1786_v8  ;;  %v2903_v27 = vrot.slane %v2004_v15, %v1784_v7 }
  0xd6   :  { %v459_v14 = vrot.slane %v435_v52, %v1780_v5  ;;  %v2907_v52 = vrot.slane %v2906_v41, %v1784_v7 }
  0xd7   :  { %v513_v22 = vmul.f32 %v2900_v53, %v486_v9 }
  0xd8   :  { %v98_v33 = vpop.permute.xlu0 %97  ;;  %v467_v28 = vmul.f32 %v459_v14, %v1935_v48 }
  0xd9   :  { %v120_v61 = vmul.f32 %v2101_v58, %v98_v33  ;;  %v121_v23 = vmul.f32 %v2126_v55, %v98_v33  ;;  %v557_v63 = vpop.permute.xlu1 %556  ;;  %v122_v32 = vmul.f32 %v2159_v38, %v98_v33  ;;  %v123_v46 = vmul.f32 %v2104_v60, %v98_v33 }
  0xda   :  { %v2898_v60 = vrot.slane %v1991_v3, %v1782_v6  ;;  %v2292_v3 = vadd.f32 %v381_v44, %v365_v24 }
  0xdb   :  { %v208_v58 = vadd.f32 %v2162_v47, %v120_v61  ;;  %v209_v55 = vadd.f32 %v2165_v0, %v121_v23  ;;  %v447_v47 = vrot.slane %v432_v37, %v1780_v5  ;;  %v451_v0 = vrot.slane %v433_v59, %v1780_v5 }
  0xdc   :  { %v434_v38 = vmul.f32 %v2898_v60, %v405_v51  ;;  %v211_v12 = vadd.f32 %v2183_v29, %v123_v46  ;;  %v210_v17 = vadd.f32 %v2173_v13, %v122_v32  ;;  %v2901_v51 = vld [vmem:[#allocation9_spill] sm:$0xff]  ;;  %v2904_v32 = vrot.slane %v2004_v15, %v1782_v6 }
  0xdd   :  { %v559_v25 = vpop.permute.xlu1 %558  ;;  %v288_v42 = vadd.f32 %v280_v43, %v208_v58  ;;  %v289_v37 = vadd.f32 %v281_v21, %v209_v55  ;;  %v464_v13 = vmul.f32 %v447_v47, %v1935_v48  ;;  %v465_v43 = vmul.f32 %v451_v0, %v1935_v48 }
  0xde   :  { %v455_v29 = vrot.slane %v434_v38, %v1780_v5  ;;  %v488_v21 = vsel %vm484_vm5, %v1986_v2, %v2189_v56  ;;  %v291_v40 = vadd.f32 %v283_v16, %v211_v12  ;;  %v290_v59 = vadd.f32 %v2218_v1, %v210_v17 }
  0xdf   :  { %v368_v33 = vadd.f32 %v360_v36, %v288_v42  ;;  %v2324_v49 = vmul.f32 %v447_v47, %v2901_v51  ;;  %v2327_v61 = vmul.f32 %v451_v0, %v2901_v51  ;;  %v2902_v56 = vrot.slane %v2004_v15, %v1780_v5 }
  0xe0   :  { %v369_v23 = vadd.f32 %v361_v4, %v289_v37  ;;  %v466_v2 = vmul.f32 %v455_v29, %v1935_v48  ;;  %v515_v1 = vmul.f32 %v2903_v27, %v488_v21  ;;  %v514_v46 = vmul.f32 %v2904_v32, %v485_v30  ;;  %v2905_v4 = vld [vmem:[#allocation7_spill] sm:$0xff] }
  0xe1   :  { %v563_v24 = vpop.permute.xlu1 %562  ;;  %v512_v16 = vmul.f32 %v2902_v56, %v487_v57  ;;  %v371_v44 = vadd.f32 %v363_v39, %v291_v40  ;;  %v567_v18 = vsel %vm564_vm6, %v557_v63, %v559_v25  ;;  %v531_v55 = vrot.slane %v513_v22, %v1780_v5  ;;  %v2911_v57 = vld [vmem:[#allocation5_spill] sm:$0xff] }
  0xe2   :  { %v568_v36 = vsel %vm564_vm6, %v563_v24, %v557_v63  ;;  %v565_v58 = vsel %vm564_vm6, %v2905_v4, %v563_v24  ;;  %v370_v10 = vadd.f32 %v2240_v62, %v290_v59  ;;  %v392_v60 = vadd.f32 %v384_v35, %v368_v33  ;;  %v2912_v59 = vld [vmem:[#allocation10_spill] sm:$0xff] }
  0xe3   :  { %v566_v15 = vsel %vm564_vm6, %v559_v25, %v2905_v4  ;;  %v2355_v39 = vmul.f32 %v455_v29, %v2901_v51  ;;  %v527_v63 = vrot.slane %v512_v16, %v1780_v5  ;;  %v393_v38 = vadd.f32 %v385_v54, %v369_v23  ;;  %v2914_v23 = vld [vmem:[#allocation6_spill] sm:$0xff] }
  0xe4   :  { %v595_v47 = vmul.f32 %v2907_v52, %v568_v36  ;;  %v463_v0 = vmul.f32 %v459_v14, %v2901_v51  ;;  %v539_v12 = vrot.slane %v515_v1, %v1780_v5  ;;  %v2908_v62 = vrot.slane %v2906_v41, %v1780_v5  ;;  %v2913_v51 = vld [vmem:[#allocation11_spill] sm:$0xff] }
  0xe5   :  { %v2347_v48 = vpop.permute.xlu1 %597  ;;  %v2909_v25 = vrot.slane %v2906_v41, %v1782_v6  ;;  %v2370_v42 = vrot.slane %v514_v46, %v1780_v5  ;;  %v544_v54 = vmul.f32 %v527_v63, %v2235_v19  ;;  %v395_v9 = vadd.f32 %v387_v20, %v371_v44 }
  0xe6   :  { %v592_v35 = vmul.f32 %v2908_v62, %v567_v18  ;;  %v2910_v37 = vrot.slane %v2906_v41, %v1786_v8  ;;  %v541_v21 = vmul.f32 %v531_v55, %v2911_v57  ;;  %v547_v40 = vmul.f32 %v539_v12, %v2235_v19 }
  0xe7   :  { %v594_v17 = vmul.f32 %v2909_v25, %v565_v58  ;;  %v394_v24 = vadd.f32 %v386_v31, %v370_v10  ;;  %v472_v30 = vadd.f32 %v464_v13, %v392_v60  ;;  %v473_v53 = vadd.f32 %v465_v43, %v393_v38 }
  0xe8   :  { %v593_v29 = vmul.f32 %v2910_v37, %v566_v15  ;;  %v619_v22 = vrot.slane %v595_v47, %v1780_v5  ;;  %v607_v56 = vrot.slane %v592_v35, %v1780_v5  ;;  %v2915_v27 = vrot.slane %v2914_v23, %v1780_v5  ;;  %v2917_v15 = vld [vmem:[#allocation8_spill] sm:$0xff] }
  0xe9   :  { %v637_v14 = vpop.permute.xlu1 %636  ;;  %v615_v16 = vrot.slane %v594_v17, %v1780_v5  ;;  %v2916_v13 = vrot.slane %v2914_v23, %v1784_v7  ;;  %v545_v1 = vmul.f32 %v531_v55, %v2235_v19  ;;  %v546_v36 = vmul.f32 %v2370_v42, %v2235_v19 }
  0xea   :  { %v647_v33 = vsel %vm644_vm7, %v637_v14, %v2912_v59  ;;  %v648_v20 = vsel %vm644_vm7, %v2913_v51, %v637_v14  ;;  %v611_v32 = vrot.slane %v593_v29, %v1780_v5  ;;  %v475_v46 = vadd.f32 %v467_v28, %v395_v9 }
  0xeb   :  { %v672_v31 = vmul.f32 %v2915_v27, %v647_v33  ;;  %v675_v43 = vmul.f32 %v2916_v13, %v648_v20  ;;  %v552_v18 = vadd.f32 %v544_v54, %v472_v30  ;;  %v474_v4 = vadd.f32 %v466_v2, %v394_v24 }
  0xec   :  { %v553_v60 = vadd.f32 %v545_v1, %v473_v53  ;;  %v627_v55 = vmul.f32 %v619_v22, %v2917_v15  ;;  %v2918_v19 = vrot.slane %v2914_v23, %v1786_v8  ;;  %v2919_v28 = vrot.slane %v2914_v23, %v1782_v6 }
  0xed   :  { %v641_v44 = vpop.permute.xlu1 %640  ;;  %v624_v2 = vmul.f32 %v607_v56, %v2917_v15  ;;  %v626_v52 = vmul.f32 %v615_v16, %v2917_v15  ;;  %v687_v47 = vrot.slane %v672_v31, %v1780_v5  ;;  %v699_v62 = vrot.slane %v675_v43, %v1780_v5 }
  0xee   :  { %v645_v58 = vsel %vm644_vm7, %v641_v44, %v2913_v51  ;;  %v646_v10 = vsel %vm644_vm7, %v2912_v59, %v641_v44  ;;  %v625_v35 = vmul.f32 %v611_v32, %v2917_v15  ;;  %v555_v25 = vadd.f32 %v547_v40, %v475_v46 }
  0xef   :  { %v673_v38 = vmul.f32 %v2918_v19, %v646_v10  ;;  %v674_v41 = vmul.f32 %v2919_v28, %v645_v58  ;;  %v632_v37 = vadd.f32 %v624_v2, %v552_v18  ;;  %v554_v29 = vadd.f32 %v546_v36, %v474_v4 }
  0xf0   :  { %v633_v30 = vadd.f32 %v625_v35, %v553_v60  ;;  %v635_v53 = vadd.f32 %v627_v55, %v555_v25  ;;  %v468_v51 = vadd.f32 %v2324_v49, %v2289_v45  ;;  %v540_v20 = vmul.f32 %v527_v63, %v2911_v57 }
  0xf1   :  { %v691_v17 = vrot.slane %v673_v38, %v1780_v5  ;;  %v695_v54 = vrot.slane %v674_v41, %v1780_v5  ;;  %v682_v9 = vpop.permute.xlu1 %681  ;;  %v634_v23 = vadd.f32 %v626_v52, %v554_v29  ;;  %v469_v27 = vadd.f32 %v2327_v61, %v2292_v3  ;;  %v1670_v29 = vld [vmem:[%s2867_s1 + $0x1c] sm:$0xf] }
  0xf2   :  { %v704_v14 = vmul.f32 %v687_v47, %v682_v9  ;;  %v707_v24 = vmul.f32 %v699_v62, %v682_v9  ;;  %v621_v31 = vmul.f32 %v611_v32, %v2347_v48  ;;  %v471_v1 = vadd.f32 %v463_v0, %v2302_v11 }
  0xf3   :  { %v705_v59 = vmul.f32 %v691_v17, %v682_v9  ;;  %v706_v33 = vmul.f32 %v695_v54, %v682_v9  ;;  %v543_v36 = vmul.f32 %v539_v12, %v2911_v57  ;;  %v620_v46 = vmul.f32 %v607_v56, %v2347_v48 }
  0xf4   :  { %v712_v40 = vadd.f32 %v704_v14, %v632_v37  ;;  %v715_v43 = vadd.f32 %v707_v24, %v635_v53  ;;  %v549_v45 = vadd.f32 %v541_v21, %v469_v27  ;;  %v701_v49 = vmul.f32 %v691_v17, %v2220_v34  ;;  %v1327_v14 = vld [vmem:[%s2868_s4 + $0x8] sm:$0xff] }
  0xf5   :  { %v713_v13 = vadd.f32 %v705_v59, %v633_v30  ;;  %v714_v18 = vadd.f32 %v706_v33, %v634_v23  ;;  %v548_v58 = vadd.f32 %v540_v20, %v468_v51  ;;  %v542_v3 = vmul.f32 %v2370_v42, %v2911_v57  ;;  %1672 = vmatprep.mubr.msk.f32.mxu0 %vm1430_vm8, %v1327_v14 }
  0xf6   :  { %v724_v44 = vpop.permute.xlu1 %723  ;;  %v623_v61 = vmul.f32 %v619_v22, %v2347_v48  ;;  %v700_v32 = vmul.f32 %v687_v47, %v2220_v34  ;;  %v629_v11 = vadd.f32 %v621_v31, %v549_v45  ;;  %v470_v21 = vadd.f32 %v2355_v39, %v2294_v26  ;;  %1676 = vmatprep.mubr.msk.f32.mxu1 %vm1430_vm8, %v1327_v14  ;;  %v1406_v45 = vld [vmem:[%s2869_s5] sm:$0xff] }
  0xf7   :  { %v730_v63 = vadd.f32 %v724_v44, %v712_v40  ;;  %v731_v4 = vadd.f32 %v724_v44, %v713_v13  ;;  %v733_v0 = vadd.f32 %v724_v44, %v715_v43  ;;  %v622_v10 = vmul.f32 %v615_v16, %v2347_v48 }
  0xf8   :  { %v628_v60 = vadd.f32 %v620_v46, %v548_v58  ;;  %v732_v15 = vadd.f32 %v724_v44, %v714_v18  ;;  %v551_v19 = vadd.f32 %v543_v36, %v471_v1  ;;  %v703_v42 = vmul.f32 %v699_v62, %v2220_v34  ;;  %v1407_v44 = vld [vmem:[%s2869_s5 + $0x8] sm:$0xff] }
  0xf9   :  { %v2431_v12 = vmax.f32 %v730_v63, 0.0  ;;  %v2433_v56 = vmax.f32 %v731_v4, 0.0  ;;  %v709_v57 = vadd.f32 %v701_v49, %v629_v11  ;;  %v550_v22 = vadd.f32 %v542_v3, %v470_v21 }
  0xfa   :  { %v719_v55 = vpop.permute.xlu1 %718  ;;  %v702_v38 = vmul.f32 %v695_v54, %v2220_v34  ;;  %v708_v28 = vadd.f32 %v700_v32, %v628_v60  ;;  %v631_v26 = vadd.f32 %v623_v61, %v551_v19  ;;  %v2444_v39 = vmax.f32 %v733_v0, 0.0  ;;  %v1408_v0 = vld [vmem:[%s2869_s5 + $0x10] sm:$0xff]  ;;  %v1409_v60 = vld [vmem:[%s2869_s5 + $0x18] sm:$0xff] }
  0xfb   :  { %1200 = vrot.lane.b32.xlu1 %v2433_v56, %s1736_s7  ;;  %1196 = vrot.lane.b32.xlu0 %v2431_v12, %s1736_s7  ;;  %v727_v48 = vadd.f32 %v719_v55, %v709_v57  ;;  %v630_v16 = vadd.f32 %v622_v10, %v550_v22  ;;  %v2446_v41 = vmax.f32 %v732_v15, 0.0  ;;  %v1235_v24 = vrot.slane %v1670_v29, %v1784_v7  ;;  %v1669_v15 = vld [vmem:[%s2867_s1 + $0x18] sm:$0xf] }
  0xfc   :  { %v726_v2 = vadd.f32 %v719_v55, %v708_v28  ;;  %v711_v52 = vadd.f32 %v703_v42, %v631_v26  ;;  %v1227_v30 = vrot.slane %v1670_v29, %v1786_v8  ;;  %v1231_v53 = vrot.slane %v1670_v29, %v1782_v6 }
  0xfd   :  { %v710_v47 = vadd.f32 %v702_v38, %v630_v16  ;;  %v2452_v62 = vmax.f32 %v727_v48, 0.0  ;;  %v1223_v33 = vrot.slane %v1670_v29, %v1780_v5  ;;  %v1165_v19 = vrot.slane %v1669_v15, %v1784_v7 }
  0xfe   :  { %v729_v34 = vadd.f32 %v719_v55, %v711_v52  ;;  %v2454_v25 = vmax.f32 %v726_v2, 0.0  ;;  %v1157_v42 = vrot.slane %v1669_v15, %v1786_v8  ;;  %v1161_v57 = vrot.slane %v1669_v15, %v1782_v6 }
  0xff   :  { %1208 = vrot.lane.b32.xlu1 %v2444_v39, %s1736_s7  ;;  %1204 = vrot.lane.b32.xlu0 %v2446_v41, %s1736_s7  ;;  %v728_v35 = vadd.f32 %v719_v55, %v710_v47  ;;  %v1153_v22 = vrot.slane %v1669_v15, %v1780_v5 }
 0x100   :  { %v2460_v17 = vmax.f32 %v729_v34, 0.0 }
 0x101   :  { %v2462_v54 = vmax.f32 %v728_v35, 0.0 }
 0x103   :  { %1198 = vrot.lane.b32.xlu1 %v2452_v62, %s1736_s7  ;;  %1194 = vrot.lane.b32.xlu0 %v2454_v25, %s1736_s7 }
 0x107   :  { %1206 = vrot.lane.b32.xlu1 %v2460_v17, %s1736_s7  ;;  %1202 = vrot.lane.b32.xlu0 %v2462_v54, %s1736_s7 }
 0x10b   :  { %1130 = vrot.lane.b32.xlu1 %v2433_v56, %s1733_s30  ;;  %1126 = vrot.lane.b32.xlu0 %v2431_v12, %s1733_s30 }
 0x10f   :  { %1138 = vrot.lane.b32.xlu1 %v2444_v39, %s1733_s30  ;;  %1134 = vrot.lane.b32.xlu0 %v2446_v41, %s1733_s30 }
 0x113   :  { %1128 = vrot.lane.b32.xlu1 %v2452_v62, %s1733_s30  ;;  %1124 = vrot.lane.b32.xlu0 %v2454_v25, %s1733_s30 }
 0x117   :  { %1136 = vrot.lane.b32.xlu1 %v2460_v17, %s1733_s30  ;;  %1132 = vrot.lane.b32.xlu0 %v2462_v54, %s1733_s30 }
 0x11b   :  { %1060 = vrot.lane.b32.xlu1 %v2433_v56, %s1731_s2  ;;  %1056 = vrot.lane.b32.xlu0 %v2431_v12, %s1731_s2 }
 0x11f   :  { %1068 = vrot.lane.b32.xlu1 %v2444_v39, %s1731_s2  ;;  %1064 = vrot.lane.b32.xlu0 %v2446_v41, %s1731_s2 }
 0x123   :  { %1058 = vrot.lane.b32.xlu1 %v2452_v62, %s1731_s2  ;;  %1054 = vrot.lane.b32.xlu0 %v2454_v25, %s1731_s2 }
 0x127   :  { %1066 = vrot.lane.b32.xlu1 %v2460_v17, %s1731_s2  ;;  %1062 = vrot.lane.b32.xlu0 %v2462_v54, %s1731_s2 }
 0x12b   :  { %974 = vrot.lane.b32.xlu1 %v2433_v56, %s1729_s29  ;;  %970 = vrot.lane.b32.xlu0 %v2431_v12, %s1729_s29 }
 0x12f   :  { %982 = vrot.lane.b32.xlu1 %v2444_v39, %s1729_s29  ;;  %978 = vrot.lane.b32.xlu0 %v2446_v41, %s1729_s29 }
 0x133   :  { %972 = vrot.lane.b32.xlu1 %v2452_v62, %s1729_s29  ;;  %968 = vrot.lane.b32.xlu0 %v2454_v25, %s1729_s29 }
 0x137   :  { %980 = vrot.lane.b32.xlu1 %v2460_v17, %s1729_s29  ;;  %976 = vrot.lane.b32.xlu0 %v2462_v54, %s1729_s29 }
 0x13b   :  { %904 = vrot.lane.b32.xlu1 %v2433_v56, %s1727_s26  ;;  %900 = vrot.lane.b32.xlu0 %v2431_v12, %s1727_s26 }
 0x13f   :  { %912 = vrot.lane.b32.xlu1 %v2444_v39, %s1727_s26  ;;  %908 = vrot.lane.b32.xlu0 %v2446_v41, %s1727_s26 }
 0x143   :  { %902 = vrot.lane.b32.xlu1 %v2452_v62, %s1727_s26  ;;  %898 = vrot.lane.b32.xlu0 %v2454_v25, %s1727_s26 }
 0x147   :  { %910 = vrot.lane.b32.xlu1 %v2460_v17, %s1727_s26  ;;  %906 = vrot.lane.b32.xlu0 %v2462_v54, %s1727_s26 }
 0x14b   :  { %834 = vrot.lane.b32.xlu1 %v2433_v56, %s1726_s0  ;;  %830 = vrot.lane.b32.xlu0 %v2431_v12, %s1726_s0 }
 0x14f   :  { %842 = vrot.lane.b32.xlu1 %v2444_v39, %s1726_s0  ;;  %838 = vrot.lane.b32.xlu0 %v2446_v41, %s1726_s0 }
 0x153   :  { %832 = vrot.lane.b32.xlu1 %v2452_v62, %s1726_s0  ;;  %828 = vrot.lane.b32.xlu0 %v2454_v25, %s1726_s0 }
 0x157   :  { %840 = vrot.lane.b32.xlu1 %v2460_v17, %s1726_s0  ;;  %836 = vrot.lane.b32.xlu0 %v2462_v54, %s1726_s0 }
 0x15b   :  { %764 = vrot.lane.b32.xlu1 %v2433_v56, %s1725_s23  ;;  %760 = vrot.lane.b32.xlu0 %v2431_v12, %s1725_s23 }
 0x15f   :  { %772 = vrot.lane.b32.xlu1 %v2444_v39, %s1725_s23  ;;  %768 = vrot.lane.b32.xlu0 %v2446_v41, %s1725_s23 }
 0x163   :  { %762 = vrot.lane.b32.xlu1 %v2452_v62, %s1725_s23  ;;  %758 = vrot.lane.b32.xlu0 %v2454_v25, %s1725_s23 }
 0x167   :  { %770 = vrot.lane.b32.xlu1 %v2460_v17, %s1725_s23  ;;  %766 = vrot.lane.b32.xlu0 %v2462_v54, %s1725_s23 }
 0x16b   :  { %1270 = vrot.lane.b32.xlu1 %v2433_v56, %s1738_s8  ;;  %1266 = vrot.lane.b32.xlu0 %v2431_v12, %s1738_s8 }
 0x16d   :  { %v1201_v9 = vpop.permute.xlu1 %1200  ;;  %v1197_v37 = vpop.permute.xlu0 %1196 }
 0x16e   :  { %v1215_v51 = vsel %vm564_vm6, %v1197_v37, %v1201_v9 }
 0x16f   :  { %1278 = vrot.lane.b32.xlu1 %v2444_v39, %s1738_s8  ;;  %1274 = vrot.lane.b32.xlu0 %v2446_v41, %s1738_s8  ;;  %v1244_v36 = vmul.f32 %v1223_v33, %v1215_v51 }
 0x171   :  { %v1209_v59 = vpop.permute.xlu1 %1208  ;;  %v1205_v20 = vpop.permute.xlu0 %1204 }
 0x172   :  { %v1217_v23 = vsel %vm564_vm6, %v1209_v59, %v1197_v37  ;;  %v1211_v40 = vsel %vm564_vm6, %v1205_v20, %v1209_v59  ;;  %v1213_v27 = vsel %vm564_vm6, %v1201_v9, %v1205_v20 }
 0x173   :  { %1268 = vrot.lane.b32.xlu1 %v2452_v62, %s1738_s8  ;;  %v1247_v31 = vmul.f32 %v1235_v24, %v1217_v23  ;;  %1264 = vrot.lane.b32.xlu0 %v2454_v25, %s1738_s8  ;;  %v1245_v13 = vmul.f32 %v1227_v30, %v1213_v27  ;;  %v1246_v43 = vmul.f32 %v1231_v53, %v1211_v40  ;;  %v1668_v27 = vld [vmem:[%s2867_s1 + $0x14] sm:$0xf] }
 0x175   :  { %v1199_v1 = vpop.permute.xlu1 %1198  ;;  %1532 = vmatprep.subr.mxu1 %v1247_v31  ;;  %1443 = vmatprep.subr.mxu0 %v1245_v13  ;;  %v1195_v46 = vpop.permute.xlu0 %1194  ;;  %v1095_v13 = vrot.slane %v1668_v27, %v1784_v7 }
 0x176   :  { %1533 = vmatpush1.msra.mxu1 %v1246_v43  ;;  %1444 = vmatpush1.msra.mxu0 %v1244_v36  ;;  %v1214_v49 = vsel %vm564_vm6, %v1195_v46, %v1199_v1  ;;  %v1087_v43 = vrot.slane %v1668_v27, %v1786_v8  ;;  %v1083_v36 = vrot.slane %v1668_v27, %v1780_v5 }
 0x177   :  { %1276 = vrot.lane.b32.xlu1 %v2460_v17, %s1738_s8  ;;  %1272 = vrot.lane.b32.xlu0 %v2462_v54, %s1738_s8  ;;  %v1240_v21 = vmul.f32 %v1223_v33, %v1214_v49 }
 0x179   :  { %v1207_v18 = vpop.permute.xlu1 %1206  ;;  %v1203_v4 = vpop.permute.xlu0 %1202 }
 0x17a   :  { %v1216_v63 = vsel %vm564_vm6, %v1207_v18, %v1195_v46  ;;  %v1210_v3 = vsel %vm564_vm6, %v1203_v4, %v1207_v18  ;;  %v1212_v61 = vsel %vm564_vm6, %v1199_v1, %v1203_v4  ;;  %v1091_v1 = vrot.slane %v1668_v27, %v1782_v6 }
 0x17b   :  { %v1243_v58 = vmul.f32 %v1235_v24, %v1216_v63  ;;  %1417 = vperm.xlu1 %1722, %v1407_v44   ;;  %v1241_v32 = vmul.f32 %v1227_v30, %v1212_v61  ;;  %v1242_v11 = vmul.f32 %v1231_v53, %v1210_v3  ;;  %1412 = vperm.xlu0 %1721, %v1406_v45  }
 0x17d   :  { %v1131_v10 = vpop.permute.xlu1 %1130  ;;  %1534 = vmatprep.subr.mxu1 %v1243_v58  ;;  %1445 = vmatprep.subr.mxu0 %v1241_v32  ;;  %v1127_v55 = vpop.permute.xlu0 %1126 }
 0x17e   :  { %1535 = vmatpush1.msra.mxu1 %v1242_v11  ;;  %1446 = vmatpush1.msra.mxu0 %v1240_v21  ;;  %v1145_v28 = vsel %vm484_vm5, %v1127_v55, %v1131_v10 }
 0x17f   :  { %1422 = vperm.xlu1 %1722, %v1408_v0   ;;  %1427 = vperm.xlu0 %1721, %v1409_v60   ;;  %v1174_v35 = vmul.f32 %v1153_v22, %v1145_v28 }
 0x181   :  { %v1139_v38 = vpop.permute.xlu1 %1138  ;;  %v1135_v48 = vpop.permute.xlu0 %1134 }
 0x182   :  { %v1147_v26 = vsel %vm484_vm5, %v1139_v38, %v1127_v55  ;;  %v1141_v2 = vsel %vm484_vm5, %v1135_v48, %v1139_v38  ;;  %v1143_v52 = vsel %vm484_vm5, %v1131_v10, %v1135_v48 }
 0x183   :  { %v1177_v16 = vmul.f32 %v1165_v19, %v1147_v26  ;;  %v1175_v47 = vmul.f32 %v1157_v42, %v1143_v52  ;;  %v1176_v34 = vmul.f32 %v1161_v57, %v1141_v2 }
 0x185   :  { %v1129_v9 = vpop.permute.xlu1 %1128  ;;  %1536 = vmatprep.subr.mxu1 %v1177_v16  ;;  %1447 = vmatprep.subr.mxu0 %v1175_v47  ;;  %v1125_v37 = vpop.permute.xlu0 %1124 }
 0x186   :  { %1537 = vmatpush1.msra.mxu1 %v1176_v34  ;;  %1448 = vmatpush1.msra.mxu0 %v1174_v35  ;;  %v1144_v14 = vsel %vm484_vm5, %v1125_v37, %v1129_v9 }
 0x187   :  { %v1170_v23 = vmul.f32 %v1153_v22, %v1144_v14 }
 0x189   :  { %v1137_v29 = vpop.permute.xlu1 %1136  ;;  %v1133_v30 = vpop.permute.xlu0 %1132 }
 0x18a   :  { %v1146_v24 = vsel %vm484_vm5, %v1137_v29, %v1125_v37  ;;  %v1140_v59 = vsel %vm484_vm5, %v1133_v30, %v1137_v29  ;;  %v1142_v33 = vsel %vm484_vm5, %v1129_v9, %v1133_v30  ;;  %v1666_v30 = vld [vmem:[%s2867_s1 + $0x8] sm:$0xf] }
 0x18b   :  { %v1173_v53 = vmul.f32 %v1165_v19, %v1146_v24  ;;  %v1171_v51 = vmul.f32 %v1157_v42, %v1142_v33  ;;  %v1172_v20 = vmul.f32 %v1161_v57, %v1140_v59  ;;  %v1667_v42 = vld [vmem:[%s2867_s1 + $0xc] sm:$0xf] }
 0x18c   :  { %v1001_v26 = vrot.slane %v1667_v42, %v1786_v8  ;;  %v997_v2 = vrot.slane %v1667_v42, %v1780_v5  ;;  %v1005_v52 = vrot.slane %v1667_v42, %v1782_v6  ;;  %v1009_v47 = vrot.slane %v1667_v42, %v1784_v7 }
 0x18d   :  { %v1061_v40 = vpop.permute.xlu1 %1060  ;;  %1538 = vmatprep.subr.mxu1 %v1173_v53  ;;  %1449 = vmatprep.subr.mxu0 %v1171_v51  ;;  %v1057_v31 = vpop.permute.xlu0 %1056 }
 0x18e   :  { %1539 = vmatpush1.msra.mxu1 %v1172_v20  ;;  %1450 = vmatpush1.msra.mxu0 %v1170_v23  ;;  %v1075_v44 = vsel %vm404_vm4, %v1057_v31, %v1061_v40 }
 0x18f   :  { %v1104_v61 = vmul.f32 %v1083_v36, %v1075_v44 }
 0x191   :  { %v1069_v46 = vpop.permute.xlu1 %1068  ;;  %v1065_v45 = vpop.permute.xlu0 %1064 }
 0x192   :  { %v1077_v18 = vsel %vm404_vm4, %v1069_v46, %v1057_v31  ;;  %v1071_v63 = vsel %vm404_vm4, %v1065_v45, %v1069_v46  ;;  %v1073_v4 = vsel %vm404_vm4, %v1061_v40, %v1065_v45  ;;  %v931_v40 = vrot.slane %v1666_v30, %v1786_v8 }
 0x193   :  { %v1107_v49 = vmul.f32 %v1095_v13, %v1077_v18  ;;  %v1105_v58 = vmul.f32 %v1087_v43, %v1073_v4  ;;  %v1106_v3 = vmul.f32 %v1091_v1, %v1071_v63  ;;  %v939_v46 = vrot.slane %v1666_v30, %v1784_v7 }
 0x195   :  { %v1059_v32 = vpop.permute.xlu1 %1058  ;;  %1540 = vmatprep.subr.mxu1 %v1107_v49  ;;  %1451 = vmatprep.subr.mxu0 %v1105_v58  ;;  %v1055_v11 = vpop.permute.xlu0 %1054 }
 0x196   :  { %1541 = vmatpush1.msra.mxu1 %v1106_v3  ;;  %1452 = vmatpush1.msra.mxu0 %v1104_v61  ;;  %v1074_v21 = vsel %vm404_vm4, %v1055_v11, %v1059_v32 }
 0x197   :  { %v1100_v38 = vmul.f32 %v1083_v36, %v1074_v21  ;;  %v935_v36 = vrot.slane %v1666_v30, %v1782_v6 }
 0x199   :  { %v1067_v0 = vpop.permute.xlu1 %1066  ;;  %v1063_v60 = vpop.permute.xlu0 %1062 }
 0x19a   :  { %v1076_v10 = vsel %vm404_vm4, %v1067_v0, %v1055_v11  ;;  %v1070_v55 = vsel %vm404_vm4, %v1063_v60, %v1067_v0  ;;  %v1072_v19 = vsel %vm404_vm4, %v1059_v32, %v1063_v60 }
 0x19b   :  { %v1103_v15 = vmul.f32 %v1095_v13, %v1076_v10  ;;  %v1101_v57 = vmul.f32 %v1087_v43, %v1072_v19  ;;  %v1102_v22 = vmul.f32 %v1091_v1, %v1070_v55  ;;  %v927_v43 = vrot.slane %v1666_v30, %v1780_v5  ;;  %v1665_v10 = vld [vmem:[%s2867_s1 + $0x4] sm:$0xf] }
 0x19d   :  { %v975_v28 = vpop.permute.xlu1 %974  ;;  %1542 = vmatprep.subr.mxu1 %v1103_v15  ;;  %1453 = vmatprep.subr.mxu0 %v1101_v57  ;;  %v971_v48 = vpop.permute.xlu0 %970 }
 0x19e   :  { %1543 = vmatpush1.msra.mxu1 %v1102_v22  ;;  %v989_v16 = vsel %vm300_vm3, %v971_v48, %v975_v28  ;;  %1454 = vmatpush1.msra.mxu0 %v1100_v38  ;;  %v861_v38 = vrot.slane %v1665_v10, %v1786_v8 }
 0x19f   :  { %1544 = vmatprep.subr.mxu1 %v2444_v39  ;;  %1455 = vmatprep.subr.mxu0 %v2433_v56  ;;  %v1019_v35 = vmul.f32 %v1001_v26, %v989_v16  ;;  %v857_v16 = vrot.slane %v1665_v10, %v1780_v5 }
 0x1a0   :  { %1545 = vmatpush1.msra.mxu1 %v2446_v41  ;;  %1456 = vmatpush1.msra.mxu0 %v2431_v12 }
 0x1a1   :  { %v983_v34 = vpop.permute.xlu1 %982  ;;  %1546 = vmatprep.subr.mxu1 %v2460_v17  ;;  %1457 = vmatprep.subr.mxu0 %v2452_v62  ;;  %v979_v39 = vpop.permute.xlu0 %978 }
 0x1a2   :  { %v991_v9 = vsel %vm300_vm3, %v983_v34, %v971_v48  ;;  %1547 = vmatpush1.msra.mxu1 %v2462_v54  ;;  %v985_v41 = vsel %vm300_vm3, %v979_v39, %v983_v34  ;;  %v987_v37 = vsel %vm300_vm3, %v975_v28, %v979_v39  ;;  %1458 = vmatpush1.msra.mxu0 %v2454_v25 }
 0x1a3   :  { %v1018_v56 = vmul.f32 %v997_v2, %v991_v9  ;;  %v1020_v12 = vmul.f32 %v1005_v52, %v987_v37  ;;  %v1021_v17 = vmul.f32 %v1009_v47, %v985_v41  ;;  %1459 = vmatprep.subr.mxu0 %v1019_v35 }
 0x1a5   :  { %v973_v29 = vpop.permute.xlu1 %972  ;;  %1460 = vmatpush1.msra.mxu0 %v1018_v56  ;;  %1548 = vmatprep.subr.mxu1 %v1021_v17  ;;  %v969_v14 = vpop.permute.xlu0 %968 }
 0x1a6   :  { %v988_v62 = vsel %vm300_vm3, %v969_v14, %v973_v29  ;;  %1549 = vmatpush1.msra.mxu1 %v1020_v12 }
 0x1a7   :  { %v1015_v54 = vmul.f32 %v1001_v26, %v988_v62 }
 0x1a9   :  { %v981_v24 = vpop.permute.xlu1 %980  ;;  %1461 = vmatprep.subr.mxu0 %v1015_v54  ;;  %v977_v53 = vpop.permute.xlu0 %976 }
 0x1aa   :  { %v990_v25 = vsel %vm300_vm3, %v981_v24, %v969_v14  ;;  %v984_v33 = vsel %vm300_vm3, %v977_v53, %v981_v24  ;;  %v986_v51 = vsel %vm300_vm3, %v973_v29, %v977_v53  ;;  %v782_v24 = vld [vmem:[%s2867_s1] sm:$0xf] }
 0x1ab   :  { %v1014_v59 = vmul.f32 %v997_v2, %v990_v25  ;;  %v1016_v20 = vmul.f32 %v1005_v52, %v986_v51  ;;  %v1017_v23 = vmul.f32 %v1009_v47, %v984_v33  ;;  %v865_v52 = vrot.slane %v1665_v10, %v1782_v6 }
 0x1ac   :  { %v869_v47 = vrot.slane %v1665_v10, %v1784_v7 }
 0x1ad   :  { %v905_v27 = vpop.permute.xlu1 %904  ;;  %1462 = vmatpush1.msra.mxu0 %v1014_v59  ;;  %1550 = vmatprep.subr.mxu1 %v1017_v23  ;;  %v901_v31 = vpop.permute.xlu0 %900  ;;  %v791_v23 = vrot.slane %v782_v24, %v1786_v8 }
 0x1ae   :  { %v919_v13 = vsel %vm220_vm2, %v901_v31, %v905_v27  ;;  %1551 = vmatpush1.msra.mxu1 %v1016_v20 }
 0x1af   :  { %v949_v1 = vmul.f32 %v931_v40, %v919_v13  ;;  %v787_v13 = vrot.slane %v782_v24, %v1780_v5 }
 0x1b1   :  { %v913_v44 = vpop.permute.xlu1 %912  ;;  %1463 = vmatprep.subr.mxu0 %v949_v1  ;;  %v909_v45 = vpop.permute.xlu0 %908  ;;  %v795_v1 = vrot.slane %v782_v24, %v1782_v6 }
 0x1b2   :  { %v921_v18 = vsel %vm220_vm2, %v913_v44, %v901_v31  ;;  %v915_v63 = vsel %vm220_vm2, %v909_v45, %v913_v44  ;;  %v917_v4 = vsel %vm220_vm2, %v905_v27, %v909_v45 }
 0x1b3   :  { %v948_v49 = vmul.f32 %v927_v43, %v921_v18  ;;  %v950_v58 = vmul.f32 %v935_v36, %v917_v4  ;;  %v951_v3 = vmul.f32 %v939_v46, %v915_v63 }
 0x1b5   :  { %v903_v61 = vpop.permute.xlu1 %902  ;;  %1464 = vmatpush1.msra.mxu0 %v948_v49  ;;  %1552 = vmatprep.subr.mxu1 %v951_v3  ;;  %v899_v32 = vpop.permute.xlu0 %898 }
 0x1b6   :  { %v918_v11 = vsel %vm220_vm2, %v899_v32, %v903_v61  ;;  %1553 = vmatpush1.msra.mxu1 %v950_v58 }
 0x1b7   :  { %v945_v0 = vmul.f32 %v931_v40, %v918_v11 }
 0x1b9   :  { %v911_v21 = vpop.permute.xlu1 %910  ;;  %1465 = vmatprep.subr.mxu0 %v945_v0  ;;  %v907_v15 = vpop.permute.xlu0 %906 }
 0x1ba   :  { %v920_v60 = vsel %vm220_vm2, %v911_v21, %v899_v32  ;;  %v914_v19 = vsel %vm220_vm2, %v907_v15, %v911_v21  ;;  %v916_v42 = vsel %vm220_vm2, %v903_v61, %v907_v15 }
 0x1bb   :  { %v944_v55 = vmul.f32 %v927_v43, %v920_v60  ;;  %v946_v57 = vmul.f32 %v935_v36, %v916_v42  ;;  %v947_v22 = vmul.f32 %v939_v46, %v914_v19  ;;  %v799_v36 = vrot.slane %v782_v24, %v1784_v7 }
 0x1bd   :  { %v835_v28 = vpop.permute.xlu1 %834  ;;  %1466 = vmatpush1.msra.mxu0 %v944_v55  ;;  %1554 = vmatprep.subr.mxu1 %v947_v22  ;;  %v831_v26 = vpop.permute.xlu0 %830  ;;  %v1671_v22 = vld [vmem:[%s2867_s1 + $0x20] sm:$0xf] }
 0x1be   :  { %v849_v48 = vsel %vm140_vm1, %v831_v26, %v835_v28  ;;  %1555 = vmatpush1.msra.mxu1 %v946_v57 }
 0x1bf   :  { %v879_v2 = vmul.f32 %v861_v38, %v849_v48  ;;  %v1301_v48 = vrot.slane %v1671_v22, %v1782_v6 }
 0x1c1   :  { %v843_v34 = vpop.permute.xlu1 %842  ;;  %1467 = vmatprep.subr.mxu0 %v879_v2  ;;  %v839_v9 = vpop.permute.xlu0 %838 }
 0x1c2   :  { %v851_v35 = vsel %vm140_vm1, %v843_v34, %v831_v26  ;;  %v845_v56 = vsel %vm140_vm1, %v839_v9, %v843_v34  ;;  %v847_v41 = vsel %vm140_vm1, %v835_v28, %v839_v9  ;;  %v1305_v28 = vrot.slane %v1671_v22, %v1784_v7 }
 0x1c3   :  { %v878_v39 = vmul.f32 %v857_v16, %v851_v35  ;;  %v880_v37 = vmul.f32 %v865_v52, %v847_v41  ;;  %v881_v12 = vmul.f32 %v869_v47, %v845_v56  ;;  %v1297_v26 = vrot.slane %v1671_v22, %v1786_v8 }
 0x1c5   :  { %v833_v17 = vpop.permute.xlu1 %832  ;;  %1468 = vmatpush1.msra.mxu0 %v878_v39  ;;  %1556 = vmatprep.subr.mxu1 %v881_v12  ;;  %v829_v29 = vpop.permute.xlu0 %828 }
 0x1c6   :  { %v848_v14 = vsel %vm140_vm1, %v829_v29, %v833_v17  ;;  %1557 = vmatpush1.msra.mxu1 %v880_v37 }
 0x1c7   :  { %v875_v62 = vmul.f32 %v861_v38, %v848_v14 }
 0x1c9   :  { %v841_v54 = vpop.permute.xlu1 %840  ;;  %1469 = vmatprep.subr.mxu0 %v875_v62  ;;  %v837_v25 = vpop.permute.xlu0 %836 }
 0x1ca   :  { %v850_v30 = vsel %vm140_vm1, %v841_v54, %v829_v29  ;;  %v844_v59 = vsel %vm140_vm1, %v837_v25, %v841_v54  ;;  %v846_v33 = vsel %vm140_vm1, %v833_v17, %v837_v25 }
 0x1cb   :  { %v874_v53 = vmul.f32 %v857_v16, %v850_v30  ;;  %v876_v51 = vmul.f32 %v865_v52, %v846_v33  ;;  %v877_v20 = vmul.f32 %v869_v47, %v844_v59  ;;  %v1293_v16 = vrot.slane %v1671_v22, %v1780_v5  ;;  %v1326_v30 = vld [vmem:[%s2868_s4] sm:$0xff]  ;;  %v1331_v59 = vld [vmem:[%s2868_s4 + $0x28] sm:$0xff] }
 0x1cc   :  { %v1330_v33 = vld [vmem:[%s2868_s4 + $0x20] sm:$0xff] }
 0x1cd   :  { %v765_v40 = vpop.permute.xlu1 %764  ;;  %1470 = vmatpush1.msra.mxu0 %v874_v53  ;;  %1558 = vmatprep.subr.mxu1 %v877_v20  ;;  %v761_v27 = vpop.permute.xlu0 %760  ;;  %v1329_v53 = vld [vmem:[%s2868_s4 + $0x18] sm:$0xff]  ;;  %v1332_v20 = vld [vmem:[%s2868_s4 + $0x30] sm:$0xff] }
 0x1ce   :  { %v779_v31 = vsel %vm59_vm0, %v761_v27, %v765_v40  ;;  %1559 = vmatpush1.msra.mxu1 %v876_v51  ;;  %v1333_v51 = vld [vmem:[%s2868_s4 + $0x38] sm:$0xff] }
 0x1cf   :  { %v809_v43 = vmul.f32 %v791_v23, %v779_v31 }
 0x1d1   :  { %v773_v46 = vpop.permute.xlu1 %772  ;;  %1471 = vmatprep.subr.mxu0 %v809_v43  ;;  %v769_v18 = vpop.permute.xlu0 %768 }
 0x1d2   :  { %v781_v44 = vsel %vm59_vm0, %v773_v46, %v761_v27  ;;  %v775_v49 = vsel %vm59_vm0, %v769_v18, %v773_v46  ;;  %v777_v63 = vsel %vm59_vm0, %v765_v40, %v769_v18 }
 0x1d3   :  { %v808_v45 = vmul.f32 %v787_v13, %v781_v44  ;;  %v810_v4 = vmul.f32 %v795_v1, %v777_v63  ;;  %v811_v58 = vmul.f32 %v799_v36, %v775_v49 }
 0x1d5   :  { %v763_v3 = vpop.permute.xlu1 %762  ;;  %1472 = vmatpush1.msra.mxu0 %v808_v45  ;;  %1560 = vmatprep.subr.mxu1 %v811_v58  ;;  %v759_v61 = vpop.permute.xlu0 %758 }
 0x1d6   :  { %v778_v32 = vsel %vm59_vm0, %v759_v61, %v763_v3  ;;  %1561 = vmatpush1.msra.mxu1 %v810_v4 }
 0x1d7   :  { %v805_v11 = vmul.f32 %v791_v23, %v778_v32 }
 0x1d9   :  { %v771_v0 = vpop.permute.xlu1 %770  ;;  %1473 = vmatprep.subr.mxu0 %v805_v11  ;;  %v767_v10 = vpop.permute.xlu0 %766 }
 0x1da   :  { %v780_v21 = vsel %vm59_vm0, %v771_v0, %v759_v61  ;;  %v774_v15 = vsel %vm59_vm0, %v767_v10, %v771_v0  ;;  %v776_v55 = vsel %vm59_vm0, %v763_v3, %v767_v10 }
 0x1db   :  { %v804_v60 = vmul.f32 %v787_v13, %v780_v21  ;;  %v806_v19 = vmul.f32 %v795_v1, %v776_v55  ;;  %v807_v42 = vmul.f32 %v799_v36, %v774_v15 }
 0x1dd   :  { %v1271_v57 = vpop.permute.xlu1 %1270  ;;  %1474 = vmatpush1.msra.mxu0 %v804_v60  ;;  %1562 = vmatprep.subr.mxu1 %v807_v42  ;;  %v1267_v38 = vpop.permute.xlu0 %1266 }
 0x1de   :  { %1563 = vmatpush1.msra.mxu1 %v806_v19  ;;  %v1285_v52 = vsel %vm644_vm7, %v1267_v38, %v1271_v57 }
 0x1df   :  { %v1314_v6 = vmul.f32 %v1293_v16, %v1285_v52 }
 0x1e1   :  { %v1279_v2 = vpop.permute.xlu1 %1278  ;;  %v1275_v34 = vpop.permute.xlu0 %1274 }
 0x1e2   :  { %v1287_v47 = vsel %vm644_vm7, %v1279_v2, %v1267_v38  ;;  %v1281_v9 = vsel %vm644_vm7, %v1275_v34, %v1279_v2  ;;  %v1283_v7 = vsel %vm644_vm7, %v1271_v57, %v1275_v34 }
 0x1e3   :  { %v1317_v35 = vmul.f32 %v1305_v28, %v1287_v47  ;;  %v1315_v8 = vmul.f32 %v1297_v26, %v1283_v7  ;;  %v1316_v39 = vmul.f32 %v1301_v48, %v1281_v9 }
 0x1e5   :  { %v1269_v56 = vpop.permute.xlu1 %1268  ;;  %1592 = vmatprep.subr.mxu1 %v1317_v35  ;;  %1503 = vmatprep.subr.mxu0 %v1315_v8  ;;  %v1265_v5 = vpop.permute.xlu0 %1264 }
 0x1e6   :  { %1593 = vmatpush2.msra.mxu1 %v1316_v39  ;;  %1504 = vmatpush2.msra.mxu0 %v1314_v6  ;;  %v1284_v37 = vsel %vm644_vm7, %v1265_v5, %v1269_v56 }
 0x1e7   :  { %v1310_v25 = vmul.f32 %v1293_v16, %v1284_v37 }
 0x1e9   :  { %v1277_v41 = vpop.permute.xlu1 %1276  ;;  %v1273_v17 = vpop.permute.xlu0 %1272 }
 0x1ea   :  { %v1286_v12 = vsel %vm644_vm7, %v1277_v41, %v1265_v5  ;;  %v1280_v14 = vsel %vm644_vm7, %v1273_v17, %v1277_v41  ;;  %v1282_v62 = vsel %vm644_vm7, %v1269_v56, %v1273_v17 }
 0x1eb   :  { %v1313_v29 = vmul.f32 %v1305_v28, %v1286_v12  ;;  %v1311_v54 = vmul.f32 %v1297_v26, %v1282_v62  ;;  %v1312_v24 = vmul.f32 %v1301_v48, %v1280_v14 }
 0x1ed   :  { %1594 = vmatprep.subr.mxu1 %v1313_v29  ;;  %1505 = vmatprep.subr.mxu0 %v1311_v54 }
 0x1ee   :  { %1595 = vmatpush2.msra.mxu1 %v1312_v24  ;;  %1506 = vmatpush2.msra.mxu0 %v1310_v25 }
 0x1ef   :  { %1597 = vmatmul.mubr.f32.vlgmr.msra.gmra.mxu1 %v1326_v30  ;;  %1508 = vmatmul.mubr.f32.vlgmr.msra.gmra.mxu0 %v1326_v30 }
 0x1f0   :  { %1677 = vmatprep.mubr.msk.f32.mxu1 %vm1430_vm8, %v1329_v53  ;;  %1673 = vmatprep.mubr.msk.f32.mxu0 %vm1430_vm8, %v1329_v53 }
 0x1f3   :  { %1603 = vmatmul.mubr.f32.gmra.mxu1 %v1328_v50  ;;  %1514 = vmatmul.mubr.f32.gmra.mxu0 %v1328_v50 }
 0x1f4   :  { %1678 = vmatprep.mubr.msk.f32.mxu1 %vm1430_vm8, %v1331_v59  ;;  %1674 = vmatprep.mubr.msk.f32.mxu0 %vm1430_vm8, %v1331_v59 }
 0x1f6   :  { %v1413_v23 = vpop.permute.xlu0 %1412  ;;  %v1418_v13 = vpop.permute.xlu1 %1417 }
 0x1f7   :  { %1609 = vmatmul.mubr.f32.gmra.mxu1 %v1330_v33  ;;  %1520 = vmatmul.mubr.f32.gmra.mxu0 %v1330_v33 }
 0x1f8   :  { %1679 = vmatprep.mubr.msk.f32.mxu1 %vm1430_vm8, %v1333_v51  ;;  %1675 = vmatprep.mubr.msk.f32.mxu0 %vm1430_vm8, %v1333_v51 }
 0x1fa   :  { %v1423_v10 = vpop.permute.xlu1 %1422  ;;  %v1428_v2 = vpop.permute.xlu0 %1427 }
 0x1fb   :  { %1615 = vmatmul.mubr.f32.gmra.mxu1 %v1332_v20  ;;  %1526 = vmatmul.mubr.f32.gmra.mxu0 %v1332_v20 }
 0x2af   :  { %v1598_v40 = vpop.f32.mrf.mxu1  ;;  %v1509_v27 = vpop.f32.mrf.mxu0 }
 0x2b0   :  { %v1599_v31 = vadd.f32 %v1598_v40, %v1413_v23  ;;  %v1510_v43 = vadd.f32 %v1509_v27, %v1413_v23 }
 0x2b1   :  { %v1600_v1 = vpop.f32.mrf.mxu1  ;;  %v1511_v46 = vpop.f32.mrf.mxu0 }
 0x2b2   :  { %v1623_v36 = vmax.f32 %v1599_v31, 0.0  ;;  %v1601_v44 = vadd.f32 %v1600_v1, %v1413_v23  ;;  %v1621_v18 = vmax.f32 %v1510_v43, 0.0  ;;  %v1512_v45 = vadd.f32 %v1511_v46, %v1413_v23 }
 0x2b3   :  { %v1604_v49 = vpop.f32.mrf.mxu1  ;;  %v1515_v4 = vpop.f32.mrf.mxu0 }
 0x2b4   :  { %1680 = vst [vmem:[%s2870_s6 + $0x40] sm:$0xff] %v1623_v36  ;;  %v1624_v63 = vmax.f32 %v1601_v44, 0.0  ;;  %v1605_v58 = vadd.f32 %v1604_v49, %v1418_v13  ;;  %1637 = vst [vmem:[%s2870_s6] sm:$0xff] %v1621_v18  ;;  %v1622_v3 = vmax.f32 %v1512_v45, 0.0  ;;  %v1516_v61 = vadd.f32 %v1515_v4, %v1418_v13 }
 0x2b5   :  { %v1606_v32 = vpop.f32.mrf.mxu1  ;;  %v1517_v0 = vpop.f32.mrf.mxu0 }
 0x2b6   :  { %1681 = vst [vmem:[%s2870_s6 + $0x48] sm:$0xff] %v1624_v63  ;;  %v1627_v11 = vmax.f32 %v1605_v58, 0.0  ;;  %v1607_v21 = vadd.f32 %v1606_v32, %v1418_v13  ;;  %1638 = vst [vmem:[%s2870_s6 + $0x8] sm:$0xff] %v1622_v3  ;;  %v1625_v60 = vmax.f32 %v1516_v61, 0.0  ;;  %v1518_v15 = vadd.f32 %v1517_v0, %v1418_v13 }
 0x2b7   :  { %v1610_v55 = vpop.f32.mrf.mxu1  ;;  %v1521_v42 = vpop.f32.mrf.mxu0 }
 0x2b8   :  { %1682 = vst [vmem:[%s2870_s6 + $0x50] sm:$0xff] %v1627_v11  ;;  %v1628_v19 = vmax.f32 %v1607_v21, 0.0  ;;  %v1611_v57 = vadd.f32 %v1610_v55, %v1423_v10  ;;  %1639 = vst [vmem:[%s2870_s6 + $0x10] sm:$0xff] %v1625_v60  ;;  %v1626_v22 = vmax.f32 %v1518_v15, 0.0  ;;  %v1522_v38 = vadd.f32 %v1521_v42, %v1423_v10 }
 0x2b9   :  { %v1612_v28 = vpop.f32.mrf.mxu1  ;;  %v1523_v48 = vpop.f32.mrf.mxu0 }
 0x2ba   :  { %1683 = vst [vmem:[%s2870_s6 + $0x58] sm:$0xff] %v1628_v19  ;;  %v1631_v26 = vmax.f32 %v1611_v57, 0.0  ;;  %v1613_v16 = vadd.f32 %v1612_v28, %v1423_v10  ;;  %1640 = vst [vmem:[%s2870_s6 + $0x18] sm:$0xff] %v1626_v22  ;;  %v1629_v52 = vmax.f32 %v1522_v38, 0.0  ;;  %v1524_v47 = vadd.f32 %v1523_v48, %v1423_v10 }
 0x2bb   :  { %v1616_v34 = vpop.f32.mrf.mxu1  ;;  %v1527_v9 = vpop.f32.mrf.mxu0 }
 0x2bc   :  { %1684 = vst [vmem:[%s2870_s6 + $0x60] sm:$0xff] %v1631_v26  ;;  %v1632_v35 = vmax.f32 %v1613_v16, 0.0  ;;  %v1617_v7 = vadd.f32 %v1616_v34, %v1428_v2  ;;  %1641 = vst [vmem:[%s2870_s6 + $0x20] sm:$0xff] %v1629_v52  ;;  %v1630_v8 = vmax.f32 %v1524_v47, 0.0  ;;  %v1528_v39 = vadd.f32 %v1527_v9, %v1428_v2 }
 0x2bd   :  { %v1618_v6 = vpop.f32.mrf.mxu1  ;;  %v1529_v5 = vpop.f32.mrf.mxu0 }
 0x2be   :  { %1685 = vst [vmem:[%s2870_s6 + $0x68] sm:$0xff] %v1632_v35  ;;  %v1635_v56 = vmax.f32 %v1617_v7, 0.0  ;;  %v1619_v41 = vadd.f32 %v1618_v6, %v1428_v2  ;;  %1642 = vst [vmem:[%s2870_s6 + $0x28] sm:$0xff] %v1630_v8  ;;  %v1633_v37 = vmax.f32 %v1528_v39, 0.0  ;;  %v1530_v12 = vadd.f32 %v1529_v5, %v1428_v2 }
 0x2c0   :  { %1686 = vst [vmem:[%s2870_s6 + $0x70] sm:$0xff] %v1635_v56  ;;  %v1636_v17 = vmax.f32 %v1619_v41, 0.0  ;;  %1643 = vst [vmem:[%s2870_s6 + $0x30] sm:$0xff] %v1633_v37  ;;  %v1634_v29 = vmax.f32 %v1530_v12, 0.0 }
 0x2c2   :  { %1687 = vst [vmem:[%s2870_s6 + $0x78] sm:$0xff] %v1636_v17  ;;  %1644 = vst [vmem:[%s2870_s6 + $0x38] sm:$0xff] %v1634_v29 }

</bundles_post_ra>
